<compile_context>
chip_gen: v5e
topology: v5e:2x2
jax: 0.10.0
libtpu: 0.0.40
codegen_flags: <defaults>
</compile_context>

<pallas_src>
import jax
import jax.numpy as jnp
from jax import lax
from jax.experimental import pallas as pl
from jax.experimental.pallas import tpu as pltpu


def _round_up(x, m):
    return (x + m - 1) // m * m


def _is_v5e():
    try:
        kind = jax.devices()[0].device_kind.lower()
        return ("v5 lite" in kind) or ("v5e" in kind) or ("v5litepod" in kind)
    except Exception:
        return False


def _vmem_capacity_bytes():
    try:
        return int(pltpu.get_tpu_info().vmem_capacity_bytes)
    except Exception:
        return 64 * 1024 * 1024     # safe (v7x-sized) default


def _make_residual_kernel(use_slab):
    def kernel(x_ref, w1_ref, w2_ref, o_ref, xp_ref):
        # x_ref : (nb, H, W, C)        raw input tile (no halo, no channel pad)
        # w1_ref: (9*Cp, Cp)           3x3 weights, rows ordered (ky, kx, Cin)
        # w2_ref: (Cp, Cp)             1x1 weights, (Cin, Cout)
        # o_ref : (nb, H, W, C)
        # xp_ref: (nb, H+2, W+2, Cp)   VMEM scratch: halo'd, channel-padded tile
        nb, H, W, C = x_ref.shape
        _, Hp, Wp, Cp = xp_ref.shape          # Hp = H + 2, Wp = W + 2
        M = nb * H * W
        f32 = jnp.float32
        zdt = xp_ref.dtype

        # ---- build the zero-halo'd, channel-padded tile in VMEM -------------
        # Only the halo frame needs zeroing; it is re-zeroed EVERY grid step so
        # the persistent per-core scratch stays correct under megacore sharding
        # of the batch axis (cost ~(2/H + 2/W) of the tile -> negligible).
        zrow = jnp.zeros((nb, 1, Wp, Cp), zdt)
        zcol = jnp.zeros((nb, Hp, 1, Cp), zdt)
        xp_ref[:, 0:1, :, :] = zrow
        xp_ref[:, H + 1:H + 2, :, :] = zrow
        xp_ref[:, :, 0:1, :] = zcol
        xp_ref[:, :, W + 1:W + 2, :] = zcol

        xv = x_ref[...]
        if Cp > C:   # channel pad to a lane-dense multiple of 128 (VMEM only)
            xv = jnp.concatenate(
                [xv, jnp.zeros((nb, H, W, Cp - C), zdt)], axis=-1)
        xp_ref[:, 1:H + 1, 1:W + 1, :] = xv

        # ---- 3x3 "same" conv on the MXU, f32 accumulation --------------------
        acc = jnp.zeros((M, Cp), dtype=f32)
        if use_slab:
            # v6e/v7x: stack the 3 kx taps along the contraction axis (K=3*Cp)
            # so each dot fills more of the 256-deep MXU.
            K3 = 3 * Cp
            slab = jnp.concatenate(
                [xp_ref[:, :, kx:kx + W, :] for kx in range(3)], axis=-1)
            for ky in range(3):                        # static 3-tap unroll
                lhs = slab[:, ky:ky + H, :, :].reshape(M, K3)
                acc += jnp.dot(lhs, w1_ref[ky * K3:(ky + 1) * K3, :],
                               preferred_element_type=f32)
        else:
            # v5e: MXU is 128 deep, so nine accumulating K=Cp dots are already
            # depth-perfect; skipping the 3*Cp slab saves VMEM and vst slots.
            for ky in range(3):
                for kx in range(3):
                    tap = ky * 3 + kx
                    lhs = xp_ref[:, ky:ky + H, kx:kx + W, :].reshape(M, Cp)
                    acc += jnp.dot(lhs, w1_ref[tap * Cp:(tap + 1) * Cp, :],
                                   preferred_element_type=f32)

        # ---- ReLU -> 1x1 conv (single (M,Cp)x(Cp,Cp) matmul) -----------------
        h = jnp.maximum(acc, 0.0).astype(w2_ref.dtype)
        y = jnp.dot(h, w2_ref[...], preferred_element_type=f32)        # (M, Cp)

        # ---- residual add; store only the real C channels (no Cp writeback) --
        # The original pixels (x_ref) are still resident in VMEM -> free reuse.
        y4 = y.reshape(nb, H, W, Cp)
        o_ref[...] = (x_ref[...].astype(f32) + y4[..., :C]).astype(o_ref.dtype)

    return kernel


def residual_layer_nhwc(x_nhwc, w1_hwio, w2_io, *, batch_block=None, use_slab=None):
    """x_nhwc: (N,H,W,C); w1_hwio: (3,3,Cin,Cout); w2_io: (Cin,Cout)."""
    N, H, W, C = x_nhwc.shape
    itemsize = jnp.dtype(x_nhwc.dtype).itemsize

    if use_slab is None:
        use_slab = not _is_v5e()   # K=3*Cp slab only pays off on 256-deep MXUs

    # Lane-dense channels for the matmuls: Cp is a multiple of 128.  Only the
    # (tiny) weights are padded in HBM; activations are padded in VMEM inside
    # the kernel, so HBM activation traffic stays exactly 2*N*H*W*C*itemsize.
    Cp = _round_up(max(C, 128), 128)
    pad_c = Cp - C
    if pad_c:
        w1_hwio = jnp.pad(w1_hwio, ((0, 0), (0, 0), (0, pad_c), (0, pad_c)))
        w2_io = jnp.pad(w2_io, ((0, pad_c), (0, pad_c)))
    w1_mat = w1_hwio.reshape(9 * Cp, Cp)          # rows ordered (ky, kx, Cin)

    # ---- per-generation VMEM budget & batch-block sizing ---------------------
    vmem_cap = _vmem_capacity_bytes()
    vmem_limit = max(min(int(vmem_cap * 0.85), vmem_cap - (8 << 20)), 32 << 20)

    # Explicit per-image working-set estimate (bytes): input/output blocks are
    # double buffered; scratch, kx slab, matmul LHS temp and f32 intermediates
    # (acc / h / y) are single copies.
    bytes_io = H * W * C * itemsize * 4                       # x(2) + out(2)
    bytes_xp = (H + 2) * (W + 2) * Cp * itemsize              # halo'd scratch
    bytes_slab = (H + 2) * W * 3 * Cp * itemsize if use_slab else 0
    bytes_lhs = H * W * (3 * Cp if use_slab else Cp) * itemsize
    bytes_f32 = H * W * Cp * 4 * 3
    per_image = bytes_io + bytes_xp + bytes_slab + bytes_lhs + bytes_f32
    weight_bytes = 2 * (9 * Cp * Cp + Cp * Cp) * itemsize     # double buffered

    if batch_block is None:
        budget = int(vmem_limit * 0.7) - weight_bytes
        nb_vmem = max(1, budget // max(per_image, 1))
        # Keep >= min(N, 4) grid steps so the pipeline always has a tile to
        # prefetch against and both v7x TensorCores get work.
        nb_cap = max(1, N // min(N, 4))
        nb = int(max(1, min(N, nb_vmem, nb_cap)))
    else:
        nb = int(batch_block)
    while N % nb:              # largest divisor of N not exceeding the target
        nb -= 1
    # TODO(synk): when N == 1 (or one image exceeds the VMEM budget) add a
    # second grid axis over H row-bands (2-row halo in the index_map) so v7x's
    # two TensorCores stay busy and the tile fits its 64 MiB VMEM.
    # TODO(synk): if W % 8 != 0 the in-kernel (nb,H,W,*) <-> (M,*) reshapes
    # become relayout copies (correct, just slower); pad W to 8 if that bites.

    flops = 2 * N * H * W * Cp * Cp * 10                       # 9 taps + 1x1
    bytes_accessed = (2 * N * H * W * C + 10 * Cp * Cp) * itemsize

    out = pl.pallas_call(
        _make_residual_kernel(use_slab),
        out_shape=jax.ShapeDtypeStruct((N, H, W, C), x_nhwc.dtype),
        grid_spec=pltpu.PrefetchScalarGridSpec(
            num_scalar_prefetch=0,
            grid=(N // nb,),
            in_specs=[
                pl.BlockSpec((nb, H, W, C), lambda n: (n, 0, 0, 0)),
                # Grid-invariant weights: same block every step -> DMA'd once.
                # (Single-buffering them with pl.Buffered(1) would save another
                #  ~0.6-2.5 MiB inside v7x's 64 MiB budget.)
                pl.BlockSpec((9 * Cp, Cp), lambda n: (0, 0)),
                pl.BlockSpec((Cp, Cp), lambda n: (0, 0)),
            ],
            out_specs=pl.BlockSpec((nb, H, W, C), lambda n: (n, 0, 0, 0)),
            scratch_shapes=[
                pltpu.VMEM((nb, H + 2, W + 2, Cp), x_nhwc.dtype)],
        ),
        compiler_params=pltpu.CompilerParams(
            dimension_semantics=("parallel",),
            vmem_limit_bytes=int(vmem_limit)),
        cost_estimate=pl.CostEstimate(
            flops=flops, transcendentals=0, bytes_accessed=bytes_accessed),
    )(x_nhwc, w1_mat, w2_io)

    return out


def residual_layer(x_nchw, w1_oihw, w2_oihw):
    """PyTorch-layout forward: x + conv1x1(relu(conv3x3(x))). NCHW / OIHW."""
    x_nhwc = jnp.transpose(x_nchw, (0, 2, 3, 1))
    w1_hwio = jnp.transpose(w1_oihw, (2, 3, 1, 0))          # (ky, kx, Cin, Cout)
    w2_io = jnp.transpose(w2_oihw[:, :, 0, 0], (1, 0))      # (Cin, Cout)
    y = residual_layer_nhwc(x_nhwc, w1_hwio, w2_io)
    return jnp.transpose(y, (0, 3, 1, 2))


def _reference(x_nchw, w1_oihw, w2_oihw):
    """Pure-JAX reference (XLA conv) for correctness checking."""
    y = lax.conv_general_dilated(
        x_nchw, w1_oihw, window_strides=(1, 1), padding="SAME",
        dimension_numbers=("NCHW", "OIHW", "NCHW"))
    y = jnp.maximum(y, 0.0)
    y = lax.conv_general_dilated(
        y, w2_oihw, window_strides=(1, 1), padding="VALID",
        dimension_numbers=("NCHW", "OIHW", "NCHW"))
    return x_nchw + y


if __name__ == "__main__":
    key = jax.random.PRNGKey(0)
    k_x, k_w1, k_w2 = jax.random.split(key, 3)

    # Small shapes consistent with the module (Cin == Cout for the residual add).
    N, C, H, W = 2, 8, 16, 16
    x = jax.random.normal(k_x, (N, C, H, W), dtype=jnp.float32)
    w1 = jax.random.normal(k_w1, (C, C, 3, 3), dtype=jnp.float32) * 0.1
    w2 = jax.random.normal(k_w2, (C, C, 1, 1), dtype=jnp.float32) * 0.1

    out = jax.block_until_ready(residual_layer(x, w1, w2))
    ref = _reference(x, w1, w2)
    assert out.shape == x.shape
    assert jnp.allclose(out, ref, atol=1e-3, rtol=1e-3), \
        float(jnp.max(jnp.abs(out - ref)))
    print("KERNEL_OK")
</pallas_src>

<mosaic_0001>
module attributes {stable_mosaic.version = 11 : i64} {
  func.func @kernel(%arg0: i32, %arg1: memref<1x16x16x8xf32, #tpu.memory_space<vmem>>, %arg2: memref<1152x128xf32, #tpu.memory_space<vmem>>, %arg3: memref<128x128xf32, #tpu.memory_space<vmem>>, %arg4: memref<1x16x16x8xf32, #tpu.memory_space<vmem>>, %arg5: memref<1x18x18x128xf32, #tpu.memory_space<vmem>>) attributes {dimension_semantics = [#tpu.dimension_semantics<parallel>], iteration_bounds = array<i64: 2>, scalar_prefetch = 0 : i64, scratch_operands = 1 : i64, tpu.core_type = #tpu.core_type<tc>, window_params = [{transform_indices = @transform_0, window_bounds = array<i64: 1, 16, 16, 8>}, {pipeline_mode = #tpu.pipeline_mode<synchronous>, transform_indices = @transform_1, window_bounds = array<i64: 1152, 128>}, {pipeline_mode = #tpu.pipeline_mode<synchronous>, transform_indices = @transform_2, window_bounds = array<i64: 128, 128>}, {transform_indices = @transform_3, window_bounds = array<i64: 1, 16, 16, 8>}]} {
    %cst = arith.constant 0.000000e+00 : f32
    %0 = vector.broadcast %cst : f32 to vector<1x1x18x128xf32>
    %cst_0 = arith.constant 0.000000e+00 : f32
    %1 = vector.broadcast %cst_0 : f32 to vector<1x18x1x128xf32>
    %c0 = arith.constant 0 : index
    %c0_1 = arith.constant 0 : index
    %c0_2 = arith.constant 0 : index
    %c0_3 = arith.constant 0 : index
    %2 = vector.load %arg5[%c0, %c0_1, %c0_2, %c0_3] : memref<1x18x18x128xf32, #tpu.memory_space<vmem>>, vector<1x1x18x128xf32>
    tpu.vector_store %arg5[%c0, %c0_1, %c0_2, %c0_3], %0 {strides = array<i32>} : memref<1x18x18x128xf32, #tpu.memory_space<vmem>>, vector<1x1x18x128xf32>,
    %c0_4 = arith.constant 0 : index
    %c17 = arith.constant 17 : index
    %c0_5 = arith.constant 0 : index
    %c0_6 = arith.constant 0 : index
    %3 = vector.load %arg5[%c0_4, %c17, %c0_5, %c0_6] : memref<1x18x18x128xf32, #tpu.memory_space<vmem>>, vector<1x1x18x128xf32>
    tpu.vector_store %arg5[%c0_4, %c17, %c0_5, %c0_6], %0 {strides = array<i32>} : memref<1x18x18x128xf32, #tpu.memory_space<vmem>>, vector<1x1x18x128xf32>,
    %c0_7 = arith.constant 0 : index
    %c0_8 = arith.constant 0 : index
    %c0_9 = arith.constant 0 : index
    %c0_10 = arith.constant 0 : index
    %4 = vector.load %arg5[%c0_7, %c0_8, %c0_9, %c0_10] : memref<1x18x18x128xf32, #tpu.memory_space<vmem>>, vector<1x18x1x128xf32>
    tpu.vector_store %arg5[%c0_7, %c0_8, %c0_9, %c0_10], %1 {strides = array<i32>} : memref<1x18x18x128xf32, #tpu.memory_space<vmem>>, vector<1x18x1x128xf32>,
    %c0_11 = arith.constant 0 : index
    %c0_12 = arith.constant 0 : index
    %c17_13 = arith.constant 17 : index
    %c0_14 = arith.constant 0 : index
    %5 = vector.load %arg5[%c0_11, %c0_12, %c17_13, %c0_14] : memref<1x18x18x128xf32, #tpu.memory_space<vmem>>, vector<1x18x1x128xf32>
    tpu.vector_store %arg5[%c0_11, %c0_12, %c17_13, %c0_14], %1 {strides = array<i32>} : memref<1x18x18x128xf32, #tpu.memory_space<vmem>>, vector<1x18x1x128xf32>,
    %c0_15 = arith.constant 0 : index
    %c0_16 = arith.constant 0 : index
    %c0_17 = arith.constant 0 : index
    %c0_18 = arith.constant 0 : index
    %6 = vector.load %arg1[%c0_15, %c0_16, %c0_17, %c0_18] : memref<1x16x16x8xf32, #tpu.memory_space<vmem>>, vector<1x16x16x8xf32>
    %cst_19 = arith.constant 0.000000e+00 : f32
    %7 = vector.broadcast %cst_19 : f32 to vector<1x16x16x120xf32>
    %8 = tpu.concatenate %6, %7 in 3 : vector<1x16x16x8xf32>, vector<1x16x16x120xf32> -> vector<1x16x16x128xf32>
    %c0_20 = arith.constant 0 : index
    %c1 = arith.constant 1 : index
    %c1_21 = arith.constant 1 : index
    %c0_22 = arith.constant 0 : index
    %9 = vector.load %arg5[%c0_20, %c1, %c1_21, %c0_22] : memref<1x18x18x128xf32, #tpu.memory_space<vmem>>, vector<1x16x16x128xf32>
    tpu.vector_store %arg5[%c0_20, %c1, %c1_21, %c0_22], %8 {strides = array<i32>} : memref<1x18x18x128xf32, #tpu.memory_space<vmem>>, vector<1x16x16x128xf32>,
    %cst_23 = arith.constant 0.000000e+00 : f32
    %10 = vector.broadcast %cst_23 : f32 to vector<256x128xf32>
    %c0_24 = arith.constant 0 : index
    %c0_25 = arith.constant 0 : index
    %c0_26 = arith.constant 0 : index
    %c0_27 = arith.constant 0 : index
    %11 = vector.load %arg5[%c0_24, %c0_25, %c0_26, %c0_27] : memref<1x18x18x128xf32, #tpu.memory_space<vmem>>, vector<1x18x16x128xf32>
    %c0_28 = arith.constant 0 : index
    %c0_29 = arith.constant 0 : index
    %c1_30 = arith.constant 1 : index
    %c0_31 = arith.constant 0 : index
    %12 = vector.load %arg5[%c0_28, %c0_29, %c1_30, %c0_31] : memref<1x18x18x128xf32, #tpu.memory_space<vmem>>, vector<1x18x16x128xf32>
    %c0_32 = arith.constant 0 : index
    %c0_33 = arith.constant 0 : index
    %c2 = arith.constant 2 : index
    %c0_34 = arith.constant 0 : index
    %13 = vector.load %arg5[%c0_32, %c0_33, %c2, %c0_34] : memref<1x18x18x128xf32, #tpu.memory_space<vmem>>, vector<1x18x16x128xf32>
    %14 = tpu.concatenate %11, %12, %13 in 3 : vector<1x18x16x128xf32>, vector<1x18x16x128xf32>, vector<1x18x16x128xf32> -> vector<1x18x16x384xf32>
    %15 = vector.extract_strided_slice %14 {offsets = [0, 0, 0, 0], sizes = [1, 16, 16, 384], strides = [1, 1, 1, 1]} : vector<1x18x16x384xf32> to vector<1x16x16x384xf32>
    %16 = vector.shape_cast %15 : vector<1x16x16x384xf32> to vector<256x384xf32>
    %c0_35 = arith.constant 0 : index
    %c0_36 = arith.constant 0 : index
    %17 = vector.load %arg2[%c0_35, %c0_36] : memref<1152x128xf32, #tpu.memory_space<vmem>>, vector<384x128xf32>
    %cst_37 = arith.constant dense<0.000000e+00> : vector<256x128xf32>
    %18 = tpu.matmul %16, %17, %cst_37 {dimension_numbers = #tpu.dot_dimension_numbers<[1], [0], [0], [1], [0, 0, 1, 1], [], []>} : vector<256x384xf32>, vector<384x128xf32>, vector<256x128xf32> -> vector<256x128xf32>
    %19 = arith.addf %10, %18 : vector<256x128xf32>
    %20 = vector.extract_strided_slice %14 {offsets = [0, 1, 0, 0], sizes = [1, 16, 16, 384], strides = [1, 1, 1, 1]} : vector<1x18x16x384xf32> to vector<1x16x16x384xf32>
    %21 = vector.shape_cast %20 : vector<1x16x16x384xf32> to vector<256x384xf32>
    %c384 = arith.constant 384 : index
    %c0_38 = arith.constant 0 : index
    %22 = vector.load %arg2[%c384, %c0_38] : memref<1152x128xf32, #tpu.memory_space<vmem>>, vector<384x128xf32>
    %cst_39 = arith.constant dense<0.000000e+00> : vector<256x128xf32>
    %23 = tpu.matmul %21, %22, %cst_39 {dimension_numbers = #tpu.dot_dimension_numbers<[1], [0], [0], [1], [0, 0, 1, 1], [], []>} : vector<256x384xf32>, vector<384x128xf32>, vector<256x128xf32> -> vector<256x128xf32>
    %24 = arith.addf %19, %23 : vector<256x128xf32>
    %25 = vector.extract_strided_slice %14 {offsets = [0, 2, 0, 0], sizes = [1, 16, 16, 384], strides = [1, 1, 1, 1]} : vector<1x18x16x384xf32> to vector<1x16x16x384xf32>
    %26 = vector.shape_cast %25 : vector<1x16x16x384xf32> to vector<256x384xf32>
    %c768 = arith.constant 768 : index
    %c0_40 = arith.constant 0 : index
    %27 = vector.load %arg2[%c768, %c0_40] : memref<1152x128xf32, #tpu.memory_space<vmem>>, vector<384x128xf32>
    %cst_41 = arith.constant dense<0.000000e+00> : vector<256x128xf32>
    %28 = tpu.matmul %26, %27, %cst_41 {dimension_numbers = #tpu.dot_dimension_numbers<[1], [0], [0], [1], [0, 0, 1, 1], [], []>} : vector<256x384xf32>, vector<384x128xf32>, vector<256x128xf32> -> vector<256x128xf32>
    %29 = arith.addf %24, %28 : vector<256x128xf32>
    %cst_42 = arith.constant 0.000000e+00 : f32
    %30 = vector.broadcast %cst_42 : f32 to vector<256x128xf32>
    %31 = arith.maximumf %29, %30 : vector<256x128xf32>
    %c0_43 = arith.constant 0 : index
    %c0_44 = arith.constant 0 : index
    %32 = vector.load %arg3[%c0_43, %c0_44] : memref<128x128xf32, #tpu.memory_space<vmem>>, vector<128x128xf32>
    %cst_45 = arith.constant dense<0.000000e+00> : vector<256x128xf32>
    %33 = tpu.matmul %31, %32, %cst_45 {dimension_numbers = #tpu.dot_dimension_numbers<[1], [0], [0], [1], [0, 0, 1, 1], [], []>} : vector<256x128xf32>, vector<128x128xf32>, vector<256x128xf32> -> vector<256x128xf32>
    %34 = vector.shape_cast %33 : vector<256x128xf32> to vector<1x16x16x128xf32>
    %c0_46 = arith.constant 0 : index
    %c0_47 = arith.constant 0 : index
    %c0_48 = arith.constant 0 : index
    %c0_49 = arith.constant 0 : index
    %35 = vector.load %arg1[%c0_46, %c0_47, %c0_48, %c0_49] : memref<1x16x16x8xf32, #tpu.memory_space<vmem>>, vector<1x16x16x8xf32>
    %36 = vector.extract_strided_slice %34 {offsets = [0, 0, 0, 0], sizes = [1, 16, 16, 8], strides = [1, 1, 1, 1]} : vector<1x16x16x128xf32> to vector<1x16x16x8xf32>
    %37 = arith.addf %35, %36 : vector<1x16x16x8xf32>
    %c0_50 = arith.constant 0 : index
    %c0_51 = arith.constant 0 : index
    %c0_52 = arith.constant 0 : index
    %c0_53 = arith.constant 0 : index
    %38 = vector.load %arg4[%c0_50, %c0_51, %c0_52, %c0_53] : memref<1x16x16x8xf32, #tpu.memory_space<vmem>>, vector<1x16x16x8xf32>
    tpu.vector_store %arg4[%c0_50, %c0_51, %c0_52, %c0_53], %37 {strides = array<i32>} : memref<1x16x16x8xf32, #tpu.memory_space<vmem>>, vector<1x16x16x8xf32>,
    return
  }
  func.func @transform_0(%arg0: i32) -> (i32, i32, i32, i32) {
    %c0_i32 = arith.constant 0 : i32
    %c0_i32_0 = arith.constant 0 : i32
    %c0_i32_1 = arith.constant 0 : i32
    %c0_i32_2 = arith.constant 0 : i32
    return %arg0, %c0_i32, %c0_i32_0, %c0_i32_1 : i32, i32, i32, i32
  }
  func.func @transform_1(%arg0: i32) -> (i32, i32) {
    %c0_i32 = arith.constant 0 : i32
    %c0_i32_0 = arith.constant 0 : i32
    %c0_i32_1 = arith.constant 0 : i32
    return %c0_i32, %c0_i32_0 : i32, i32
  }
  func.func @transform_2(%arg0: i32) -> (i32, i32) {
    %c0_i32 = arith.constant 0 : i32
    %c0_i32_0 = arith.constant 0 : i32
    %c0_i32_1 = arith.constant 0 : i32
    return %c0_i32, %c0_i32_0 : i32, i32
  }
  func.func @transform_3(%arg0: i32) -> (i32, i32, i32, i32) {
    %c0_i32 = arith.constant 0 : i32
    %c0_i32_0 = arith.constant 0 : i32
    %c0_i32_1 = arith.constant 0 : i32
    %c0_i32_2 = arith.constant 0 : i32
    return %arg0, %c0_i32, %c0_i32_0, %c0_i32_1 : i32, i32, i32, i32
  }
}

</mosaic_0001>

<bundles_post_ra>
// kernel: tpu_custom_call.1
= control target key start
LH: loop header
LB: loop body
LE: loop exit
PB: predicated region body
PF: predicated region fallthrough
CT: control target
= control target key end

     0   :  { %8 = vsyncpa [#allocation4], 0  ;;  %s2198_s12 = smov 0   ;;  %s3307_s0 = inlined_call_operand.vmem [shape: f32[2,16,16,8], index: 0, kind: input, shape index: {}]   ;;  %s3308_s1 = inlined_call_operand.hbm [shape: f32[1152,128], index: 1, kind: input, shape index: {}]   ;;  %s3309_s2 = inlined_call_operand.vmem [shape: f32[128,128], index: 2, kind: input, shape index: {}]   ;;  %s3310_s3 = inlined_call_operand.vmem [shape: f32[2,16,16,8], index: 3, kind: output, shape index: {}]  }
   0x1 LB: > { %s124_s15 = sshll.u32 %s3308_s1, 4  ;;  %s1954_s16 = sadd.s32 4294967295, %s2172_s12   ;;  %s2172_s12 = sphi %s2198_s12, %s14_s12   ;;  %s125_s15 = int_to_ptr.hbm [resolvable:$true] %s124_s15 }
   0x2   : > { %p1956_p0 = scmp.ge.s32.totalorder %s2172_s12, 1  ;;  %p113_p1 = scmp.lt.s32.totalorder %s2172_s12, 3 }
   0x3   : > { %p2009_p2 = scmp.eq.s32.totalorder %s1954_s16, 0  ;;  %s2174_s17 = smov [#allocation3]  }
   0x4   : > { %p114_p3 = pnand %p1956_p0, %p113_p1  ;;  %s126_s18 = sshll.u32 %s2174_s17, 4  ;;  %s127_s18 = int_to_ptr.vmem [resolvable:$true] %s126_s18 }
   0x5   : > { %s2175_s19 = smov 128   ;;  %s2176_s20 = smov 8  }
   0x6   : > { %p2005_p4 = pneg %p114_p3  ;;  %153 = sbr.rel (%p114_p3) target bundleno = 958 (0x3be), region = 32 }
   0x8   : > { %p2006_p5 = pnand %p2009_p2, %p2005_p4 }
   0xa   : > { %2008 = dma.hbm_to_vmem [thread:$0]  (!%p2006_p5), %s125_s15, 18432, %s127_s18, [#allocation4], %s2175_s19, %s2175_s19, %s2176_s20  }
   0xb   : > { %2167 = dma.done.wait (%p2009_p2), [#allocation4], 18432  }
   0xc   : > { %2169 = vsyncadd (%p2009_p2), [#allocation4], 4294948864  ;;  %v2177_v0 = vmov 0.0   ;;  %p178_p6 = scmp.lt.s32.totalorder %s1954_s16, 1  ;;  %v500_v1 = vld [vmem:[#allocation3 + $0x1f8] sm:$0xff]  ;;  %v499_v3 = vld [vmem:[#allocation3 + $0x1f0] sm:$0xff] }
   0xd   : > { %204 = vst [vmem:[#allocation2 + $0xd8] sm:$0x1] %v2177_v0  ;;  %v516_v2 = vld [vmem:[#allocation3 + $0x278] sm:$0xff]  ;;  %1969 = vmatpush.msra.mxu2 %v500_v1  ;;  %v515_v4 = vld [vmem:[#allocation3 + $0x270] sm:$0xff]  ;;  %v498_v5 = vld [vmem:[#allocation3 + $0x1e8] sm:$0xff]  ;;  %533 = vmatpush.msra.mxu0 %v500_v1  ;;  %vm263_vm0 = vcmask 64512  }
   0xe   : > { %188 = vst [vmem:[#allocation2] sm:$0xff] %v2177_v0  ;;  %s3427_s16 = smov (!%p178_p6, %s1954_s16), 1  ;;  %1985 = vmatpush.msra.mxu3 %v516_v2  ;;  %v514_v6 = vld [vmem:[#allocation3 + $0x268] sm:$0xff]  ;;  %646 = vmatpush.msra.mxu1 %v516_v2  ;;  %v497_v7 = vld [vmem:[#allocation3 + $0x1e0] sm:$0xff]  ;;  %v496_v9 = vld [vmem:[#allocation3 + $0x1d8] sm:$0xff] }
   0xf   : > { %189 = vst [vmem:[#allocation2 + $0x8] sm:$0xff] %v2177_v0  ;;  %1970 = vmatpush.msra.mxu2 %v499_v3  ;;  %v513_v8 = vld [vmem:[#allocation3 + $0x260] sm:$0xff]  ;;  %534 = vmatpush.msra.mxu0 %v499_v3  ;;  %s1967_s21 = sshll.u32 %s3427_s16, 8  ;;  %v512_v10 = vld [vmem:[#allocation3 + $0x258] sm:$0xff]  ;;  %v495_v11 = vld [vmem:[#allocation3 + $0x1d0] sm:$0xff] }
  0x10   : > { %190 = vst [vmem:[#allocation2 + $0x10] sm:$0x3] %v2177_v0  ;;  %1986 = vmatpush.msra.mxu3 %v515_v4  ;;  %647 = vmatpush.msra.mxu1 %v515_v4  ;;  %s2230_s24 = scalar_lea.vmem %s3307_s0, %s1967_s21  ;;  %v511_v12 = vld [vmem:[#allocation3 + $0x250] sm:$0xff]  ;;  %v494_v13 = vld [vmem:[#allocation3 + $0x1c8] sm:$0xff]  ;;  %v493_v17 = vld [vmem:[#allocation3 + $0x1c0] sm:$0xff]  ;;  %s3177_s9 = scalar_lea.vmem %s3310_s3, %s1967_s21 }
  0x11   : > { %192 = vst [vmem:[#allocation2 + $0x198] sm:$0xff] %v2177_v0  ;;  %1971 = vmatpush.msra.mxu2 %v498_v5  ;;  %535 = vmatpush.msra.mxu0 %v498_v5  ;;  %v510_v14 = vld [vmem:[#allocation3 + $0x248] sm:$0xff]  ;;  %v2236_v15 = vld [vmem:[%s2230_s24 + $0x80] sm:$0xff]  ;;  %v509_v18 = vld [vmem:[#allocation3 + $0x240] sm:$0xff] }
  0x12   : > { %193 = vst [vmem:[#allocation2 + $0x1a0] sm:$0xff] %v2177_v0  ;;  %1987 = vmatpush.msra.mxu3 %v514_v6  ;;  %648 = vmatpush.msra.mxu1 %v514_v6  ;;  %v280_v16 = vsel %vm263_vm0, %v2236_v15, 0.0  ;;  %v492_v19 = vld [vmem:[#allocation3 + $0x1b8] sm:$0xff]  ;;  %v491_v21 = vld [vmem:[#allocation3 + $0x1b0] sm:$0xff]  ;;  %v490_v23 = vld [vmem:[#allocation3 + $0x1a8] sm:$0xff] }
  0x13   : > { %194 = vst [vmem:[#allocation2 + $0x1a8] sm:$0x3] %v2177_v0  ;;  %1972 = vmatpush.msra.mxu2 %v497_v7  ;;  %536 = vmatpush.msra.mxu0 %v497_v7  ;;  %v508_v20 = vld [vmem:[#allocation3 + $0x238] sm:$0xff]  ;;  %v507_v22 = vld [vmem:[#allocation3 + $0x230] sm:$0xff]  ;;  %v506_v24 = vld [vmem:[#allocation3 + $0x228] sm:$0xff] }
  0x14   : > { %196 = vst [vmem:[#allocation2 + $0x18] sm:$0x1] %v2177_v0  ;;  %1988 = vmatpush.msra.mxu3 %v513_v8  ;;  %649 = vmatpush.msra.mxu1 %v513_v8  ;;  %v489_v25 = vld [vmem:[#allocation3 + $0x1a0] sm:$0xff]  ;;  %v488_v27 = vld [vmem:[#allocation3 + $0x198] sm:$0xff]  ;;  %v487_v29 = vld [vmem:[#allocation3 + $0x190] sm:$0xff] }
  0x15   : > { %197 = vst [vmem:[#allocation2 + $0x30] sm:$0x1] %v2177_v0  ;;  %1973 = vmatpush.msra.mxu2 %v496_v9  ;;  %537 = vmatpush.msra.mxu0 %v496_v9  ;;  %v505_v26 = vld [vmem:[#allocation3 + $0x220] sm:$0xff]  ;;  %v504_v28 = vld [vmem:[#allocation3 + $0x218] sm:$0xff]  ;;  %v503_v30 = vld [vmem:[#allocation3 + $0x210] sm:$0xff] }
  0x16   : > { %198 = vst [vmem:[#allocation2 + $0x48] sm:$0x1] %v2177_v0  ;;  %1989 = vmatpush.msra.mxu3 %v512_v10  ;;  %650 = vmatpush.msra.mxu1 %v512_v10  ;;  %v486_v31 = vld [vmem:[#allocation3 + $0x188] sm:$0xff]  ;;  %v485_v33 = vld [vmem:[#allocation3 + $0x180] sm:$0xff]  ;;  %v532_v36 = vld [vmem:[#allocation3 + $0x2f8] sm:$0xff] }
  0x17   : > { %199 = vst [vmem:[#allocation2 + $0x60] sm:$0x1] %v2177_v0  ;;  %1974 = vmatpush.msra.mxu2 %v495_v11  ;;  %538 = vmatpush.msra.mxu0 %v495_v11  ;;  %v502_v32 = vld [vmem:[#allocation3 + $0x208] sm:$0xff]  ;;  %v501_v34 = vld [vmem:[#allocation3 + $0x200] sm:$0xff]  ;;  %v452_v37 = vld [vmem:[#allocation3 + $0x78] sm:$0xff] }
  0x18   : > { %200 = vst [vmem:[#allocation2 + $0x78] sm:$0x1] %v2177_v0  ;;  %1990 = vmatpush.msra.mxu3 %v511_v12  ;;  %651 = vmatpush.msra.mxu1 %v511_v12  ;;  %v2262_v38 = vld [vmem:[%s2230_s24] sm:$0xff]  ;;  %v248_v39 = vld [vmem:[%s2230_s24 + $0x88] sm:$0xff]  ;;  %v2276_v45 = vld [vmem:[%s2230_s24 + $0x90] sm:$0xff] }
  0x19   : > { %201 = vst [vmem:[#allocation2 + $0x90] sm:$0x1] %v2177_v0  ;;  %1975 = vmatpush.msra.mxu2 %v494_v13  ;;  %539 = vmatpush.msra.mxu0 %v494_v13  ;;  %v531_v40 = vld [vmem:[#allocation3 + $0x2f0] sm:$0xff]  ;;  %v468_v42 = vld [vmem:[#allocation3 + $0xf8] sm:$0xff]  ;;  %v264_v44 = vsel %vm263_vm0, %v2262_v38, 0.0  ;;  %v530_v46 = vld [vmem:[#allocation3 + $0x2e8] sm:$0xff] }
  0x1a   : > { %202 = vst [vmem:[#allocation2 + $0xa8] sm:$0x1] %v2177_v0  ;;  %1991 = vmatpush.msra.mxu3 %v510_v14  ;;  %652 = vmatpush.msra.mxu1 %v510_v14  ;;  %v451_v41 = vld [vmem:[#allocation3 + $0x70] sm:$0xff]  ;;  %v2270_v43 = vld [vmem:[%s2230_s24 + $0x8] sm:$0xff]  ;;  %v281_v47 = vsel %vm263_vm0, %v248_v39, 0.0  ;;  %v450_v48 = vld [vmem:[#allocation3 + $0x68] sm:$0xff] }
  0x1b   : > { %203 = vst [vmem:[#allocation2 + $0xc0] sm:$0x1] %v2177_v0  ;;  %1976 = vmatpush.msra.mxu2 %v493_v17  ;;  %540 = vmatpush.msra.mxu0 %v493_v17  ;;  %v467_v49 = vld [vmem:[#allocation3 + $0xf0] sm:$0xff]  ;;  %v2283_v50 = vld [vmem:[%s2230_s24 + $0x10] sm:$0xff]  ;;  %v265_v51 = vsel %vm263_vm0, %v2270_v43, 0.0  ;;  %v2289_v52 = vld [vmem:[%s2230_s24 + $0x98] sm:$0xff] }
  0x1c   : > { %205 = vst [vmem:[#allocation2 + $0xf0] sm:$0x1] %v2177_v0  ;;  %1992 = vmatpush.msra.mxu3 %v509_v18  ;;  %653 = vmatpush.msra.mxu1 %v509_v18  ;;  %v529_v53 = vld [vmem:[#allocation3 + $0x2e0] sm:$0xff]  ;;  %v282_v54 = vsel %vm263_vm0, %v2276_v45, 0.0  ;;  %v466_v55 = vld [vmem:[#allocation3 + $0xe8] sm:$0xff]  ;;  %v266_v57 = vsel %vm263_vm0, %v2283_v50, 0.0 }
  0x1d   : > { %206 = vst [vmem:[#allocation2 + $0x108] sm:$0x1] %v2177_v0  ;;  %1977 = vmatpush.msra.mxu2 %v492_v19  ;;  %541 = vmatpush.msra.mxu0 %v492_v19  ;;  %v2294_v56 = vld [vmem:[%s2230_s24 + $0x18] sm:$0xff]  ;;  %v449_v58 = vld [vmem:[#allocation3 + $0x60] sm:$0xff]  ;;  %v2299_v59 = vld [vmem:[%s2230_s24 + $0xa0] sm:$0xff]  ;;  %v283_v61 = vsel %vm263_vm0, %v2289_v52, 0.0 }
  0x1e   : > { %207 = vst [vmem:[#allocation2 + $0x120] sm:$0x1] %v2177_v0  ;;  %1993 = vmatpush.msra.mxu3 %v508_v20  ;;  %654 = vmatpush.msra.mxu1 %v508_v20  ;;  %v528_v60 = vld [vmem:[#allocation3 + $0x2d8] sm:$0xff]  ;;  %v465_v62 = vld [vmem:[#allocation3 + $0xe0] sm:$0xff]  ;;  %v2304_v63 = vld [vmem:[%s2230_s24 + $0x20] sm:$0xff]  ;;  %v267_v1 = vsel %vm263_vm0, %v2294_v56, 0.0 }
  0x1f   : > { %313 = vst [vmem:[#allocation2 + $0xd9] sm:$0xff] %v280_v16  ;;  %1978 = vmatpush.msra.mxu2 %v491_v21  ;;  %542 = vmatpush.msra.mxu0 %v491_v21  ;;  %v448_v2 = vld [vmem:[#allocation3 + $0x58] sm:$0xff]  ;;  %v284_v4 = vsel %vm263_vm0, %v2299_v59, 0.0  ;;  %v268_v5 = vsel %vm263_vm0, %v2304_v63, 0.0  ;;  %v2326_v9 = vld [vmem:[%s2230_s24 + $0xb0] sm:$0xff]  ;;  %v527_v13 = vld [vmem:[#allocation3 + $0x2d0] sm:$0xff] }
  0x20   : > { %208 = vst [vmem:[#allocation2 + $0x138] sm:$0x1] %v2177_v0  ;;  %1994 = vmatpush.msra.mxu3 %v507_v22  ;;  %655 = vmatpush.msra.mxu1 %v507_v22  ;;  %v2310_v3 = vld [vmem:[%s2230_s24 + $0xa8] sm:$0xff]  ;;  %v286_v12 = vsel %vm263_vm0, %v2326_v9, 0.0  ;;  %v447_v14 = vld [vmem:[#allocation3 + $0x50] sm:$0xff]  ;;  %v2340_v18 = vld [vmem:[%s2230_s24 + $0x30] sm:$0xff] }
  0x21   : > { %209 = vst [vmem:[#allocation2 + $0x150] sm:$0x1] %v2177_v0  ;;  %1979 = vmatpush.msra.mxu2 %v490_v23  ;;  %543 = vmatpush.msra.mxu0 %v490_v23  ;;  %v285_v6 = vsel %vm263_vm0, %v2310_v3, 0.0  ;;  %v2323_v8 = vld [vmem:[%s2230_s24 + $0x28] sm:$0xff]  ;;  %v2343_v19 = vld [vmem:[%s2230_s24 + $0xb8] sm:$0xff]  ;;  %v270_v20 = vsel %vm263_vm0, %v2340_v18, 0.0 }
  0x22   : > { %210 = vst [vmem:[#allocation2 + $0x168] sm:$0x1] %v2177_v0  ;;  %1995 = vmatpush.msra.mxu3 %v506_v24  ;;  %656 = vmatpush.msra.mxu1 %v506_v24  ;;  %v269_v11 = vsel %vm263_vm0, %v2323_v8, 0.0  ;;  %v287_v21 = vsel %vm263_vm0, %v2343_v19, 0.0  ;;  %v526_v22 = vld [vmem:[#allocation3 + $0x2c8] sm:$0xff]  ;;  %v463_v24 = vld [vmem:[#allocation3 + $0xd0] sm:$0xff] }
  0x23   : > { %211 = vst [vmem:[#allocation2 + $0x180] sm:$0x1] %v2177_v0  ;;  %1980 = vmatpush.msra.mxu2 %v489_v25  ;;  %544 = vmatpush.msra.mxu0 %v489_v25  ;;  %v446_v23 = vld [vmem:[#allocation3 + $0x48] sm:$0xff] }
  0x24   : > { %214 = vst [vmem:[#allocation2 + $0x29] sm:$0x1] %v2177_v0  ;;  %1996 = vmatpush.msra.mxu3 %v505_v26  ;;  %657 = vmatpush.msra.mxu1 %v505_v26 }
  0x25   : > { %215 = vst [vmem:[#allocation2 + $0x41] sm:$0x1] %v2177_v0  ;;  %1981 = vmatpush.msra.mxu2 %v488_v27  ;;  %545 = vmatpush.msra.mxu0 %v488_v27  ;;  %v2357_v27 = vld [vmem:[%s2230_s24 + $0x38] sm:$0xff] }
  0x26   : > { %216 = vst [vmem:[#allocation2 + $0x59] sm:$0x1] %v2177_v0  ;;  %1997 = vmatpush.msra.mxu3 %v504_v28  ;;  %658 = vmatpush.msra.mxu1 %v504_v28  ;;  %v347_v35 = vld [vmem:[#allocation2 + $0xd8] sm:$0xff]  ;;  %v2360_v28 = vld [vmem:[%s2230_s24 + $0xc0] sm:$0xff] }
  0x27   : > { %217 = vst [vmem:[#allocation2 + $0x71] sm:$0x1] %v2177_v0  ;;  %1982 = vmatpush.msra.mxu2 %v487_v29  ;;  %546 = vmatpush.msra.mxu0 %v487_v29  ;;  %v271_v29 = vsel %vm263_vm0, %v2357_v27, 0.0 }
  0x28   : > { %218 = vst [vmem:[#allocation2 + $0x89] sm:$0x1] %v2177_v0  ;;  %1998 = vmatpush.msra.mxu3 %v503_v30  ;;  %659 = vmatpush.msra.mxu1 %v503_v30  ;;  %v288_v30 = vsel %vm263_vm0, %v2360_v28, 0.0 }
  0x29   : > { %219 = vst [vmem:[#allocation2 + $0xa1] sm:$0x1] %v2177_v0  ;;  %1983 = vmatpush.msra.mxu2 %v486_v31  ;;  %547 = vmatpush.msra.mxu0 %v486_v31  ;;  %v525_v31 = vld [vmem:[#allocation3 + $0x2c0] sm:$0xff] }
  0x2a   : > { %220 = vst [vmem:[#allocation2 + $0xb9] sm:$0x1] %v2177_v0  ;;  %1999 = vmatpush.msra.mxu3 %v502_v32  ;;  %660 = vmatpush.msra.mxu1 %v502_v32  ;;  %v445_v32 = vld [vmem:[#allocation3 + $0x40] sm:$0xff] }
  0x2b   : > { %221 = vst [vmem:[#allocation2 + $0xd1] sm:$0x1] %v2177_v0  ;;  %1984 = vmatpush.msra.mxu2 %v485_v33  ;;  %548 = vmatpush.msra.mxu0 %v485_v33  ;;  %v462_v33 = vld [vmem:[#allocation3 + $0xc8] sm:$0xff] }
  0x2c   : > { %222 = vst [vmem:[#allocation2 + $0xe9] sm:$0x1] %v2177_v0  ;;  %2000 = vmatpush.msra.mxu3 %v501_v34  ;;  %597 = vmatmul.f32.vlgmr.msra.gmra.mxu2 %v347_v35 }
  0x2d   : > { %223 = vst [vmem:[#allocation2 + $0x101] sm:$0x1] %v2177_v0  ;;  %2084 = vmatmul.msk.f32.vlgmr.msra.gmra.mxu3 %vm263_vm0, %v2236_v15  ;;  %759 = vmatpush.msrb.mxu2 %v532_v36  ;;  %v464_v15 = vld [vmem:[#allocation3 + $0xd8] sm:$0xff]  ;;  %v2374_v36 = vld [vmem:[%s2230_s24 + $0x40] sm:$0xff] }
  0x2e   : > { %224 = vst [vmem:[#allocation2 + $0x119] sm:$0x1] %v2177_v0  ;;  %872 = vmatpush.msrb.mxu3 %v452_v37  ;;  %661 = vmatpush.msra.mxu1 %v501_v34  ;;  %v2377_v37 = vld [vmem:[%s2230_s24 + $0xc8] sm:$0xff] }
  0x2f   : > { %225 = vst [vmem:[#allocation2 + $0x131] sm:$0x1] %v2177_v0  ;;  %2085 = vmatmul.msk.f32.vlgmr.msra.gmra.mxu1 %vm263_vm0, %v2262_v38  ;;  %760 = vmatpush.msrb.mxu2 %v531_v40  ;;  %v289_v40 = vsel %vm263_vm0, %v2377_v37, 0.0 }
  0x30   : > { %226 = vst [vmem:[#allocation2 + $0x149] sm:$0x1] %v2177_v0  ;;  %873 = vmatpush.msrb.mxu3 %v451_v41  ;;  %985 = vmatpush.msrb.mxu0 %v468_v42  ;;  %v524_v41 = vld [vmem:[#allocation3 + $0x2b8] sm:$0xff] }
  0x31   : > { %227 = vst [vmem:[#allocation2 + $0x161] sm:$0x1] %v2177_v0  ;;  %761 = vmatpush.msrb.mxu2 %v530_v46  ;;  %v444_v42 = vld [vmem:[#allocation3 + $0x38] sm:$0xff] }
  0x32   : > { %228 = vst [vmem:[#allocation2 + $0x179] sm:$0x1] %v2177_v0  ;;  %874 = vmatpush.msrb.mxu3 %v450_v48  ;;  %986 = vmatpush.msrb.mxu0 %v467_v49  ;;  %v2394_v48 = vld [vmem:[%s2230_s24 + $0xd0] sm:$0xff] }
  0x33   : > { %229 = vst [vmem:[#allocation2 + $0x191] sm:$0x1] %v2177_v0  ;;  %762 = vmatpush.msrb.mxu2 %v529_v53  ;;  %v443_v53 = vld [vmem:[#allocation3 + $0x30] sm:$0xff] }
  0x34   : > { %195 = vst [vmem:[#allocation2] sm:$0x1] %v2177_v0  ;;  %987 = vmatpush.msrb.mxu0 %v466_v55  ;;  %875 = vmatpush.msrb.mxu3 %v449_v58  ;;  %v2408_v58 = vld [vmem:[%s2230_s24 + $0x50] sm:$0xff] }
  0x35   : > { %212 = vst [vmem:[#allocation2 + $0x198] sm:$0x1] %v2177_v0  ;;  %2086 = vmatmul.msk.f32.gmra.mxu3 %vm263_vm0, %v248_v39  ;;  %763 = vmatpush.msrb.mxu2 %v528_v60  ;;  %v272_v39 = vsel %vm263_vm0, %v2374_v36, 0.0  ;;  %v274_v60 = vsel %vm263_vm0, %v2408_v58, 0.0 }
  0x36   : > { %213 = vst [vmem:[#allocation2 + $0x11] sm:$0x1] %v2177_v0  ;;  %988 = vmatpush.msrb.mxu0 %v465_v62  ;;  %876 = vmatpush.msrb.mxu3 %v448_v2  ;;  %v522_v62 = vld [vmem:[#allocation3 + $0x2a8] sm:$0xff]  ;;  %v459_v2 = vld [vmem:[#allocation3 + $0xb0] sm:$0xff] }
  0x37   : > { %230 = vst [vmem:[#allocation2 + $0x1a9] sm:$0x1] %v2177_v0  ;;  %2087 = vmatmul.msk.f32.gmra.mxu1 %vm263_vm0, %v2270_v43  ;;  %764 = vmatpush.msrb.mxu2 %v527_v13  ;;  %v458_v13 = vld [vmem:[#allocation3 + $0xa8] sm:$0xff] }
  0x38   : > { %297 = vst [vmem:[#allocation2 + $0x19] sm:$0xff] %v264_v44  ;;  %877 = vmatpush.msrb.mxu3 %v447_v14  ;;  %989 = vmatpush.msrb.mxu0 %v464_v15  ;;  %v461_v44 = vld [vmem:[#allocation3 + $0xc0] sm:$0xff] }
  0x39   : > { %314 = vst [vmem:[#allocation2 + $0xe1] sm:$0xff] %v281_v47  ;;  %765 = vmatpush.msrb.mxu2 %v526_v22  ;;  %v2391_v47 = vld [vmem:[%s2230_s24 + $0x48] sm:$0xff] }
  0x3a   : > { %298 = vst [vmem:[#allocation2 + $0x21] sm:$0xff] %v265_v51  ;;  %878 = vmatpush.msrb.mxu3 %v446_v23  ;;  %990 = vmatpush.msrb.mxu0 %v463_v24  ;;  %v273_v49 = vsel %vm263_vm0, %v2391_v47, 0.0  ;;  %v290_v51 = vsel %vm263_vm0, %v2394_v48, 0.0  ;;  %v520_v22 = vld [vmem:[#allocation3 + $0x298] sm:$0xff]  ;;  %v457_v24 = vld [vmem:[#allocation3 + $0xa0] sm:$0xff] }
  0x3b   : > { %315 = vst [vmem:[#allocation2 + $0xf1] sm:$0xff] %v282_v54  ;;  %766 = vmatpush.msrb.mxu2 %v525_v31  ;;  %v460_v54 = vld [vmem:[#allocation3 + $0xb8] sm:$0xff] }
  0x3c   : > { %299 = vst [vmem:[#allocation2 + $0x31] sm:$0xff] %v266_v57  ;;  %879 = vmatpush.msrb.mxu3 %v445_v32  ;;  %991 = vmatpush.msrb.mxu0 %v462_v33  ;;  %v440_v23 = vld [vmem:[#allocation3 + $0x18] sm:$0xff]  ;;  %v519_v33 = vld [vmem:[#allocation3 + $0x290] sm:$0xff] }
  0x3d   : > { %316 = vst [vmem:[#allocation2 + $0xf9] sm:$0xff] %v283_v61  ;;  %2088 = vmatmul.msk.f32.gmra.mxu3 %vm263_vm0, %v2276_v45  ;;  %767 = vmatpush.msrb.mxu2 %v524_v41 }
  0x3e   : > { %300 = vst [vmem:[#allocation2 + $0x39] sm:$0xff] %v267_v1  ;;  %880 = vmatpush.msrb.mxu3 %v444_v42  ;;  %992 = vmatpush.msrb.mxu0 %v461_v44  ;;  %v442_v1 = vld [vmem:[#allocation3 + $0x28] sm:$0xff]  ;;  %v2476_v44 = vld [vmem:[%s2230_s24 + $0x70] sm:$0xff] }
  0x3f   : > { %v2320_v7 = vld [vmem:[#allocation2 + $0x18] sm:$0xff]  ;;  %317 = vst [vmem:[#allocation2 + $0x109] sm:$0xff] %v284_v4  ;;  %2089 = vmatmul.msk.f32.gmra.mxu1 %vm263_vm0, %v2283_v50 }
  0x40   : > { %549 = vmatmul.f32.vlgmr.msra.gmra.mxu0 %v2320_v7  ;;  %v348_v10 = vld [vmem:[#allocation2 + $0xe0] sm:$0xff]  ;;  %301 = vst [vmem:[#allocation2 + $0x49] sm:$0xff] %v268_v5  ;;  %881 = vmatpush.msrb.mxu3 %v443_v53  ;;  %v2425_v5 = vld [vmem:[%s2230_s24 + $0x58] sm:$0xff] }
  0x41   : > { %600 = vmatmul.f32.gmra.mxu2 %v348_v10  ;;  %318 = vst [vmem:[#allocation2 + $0x111] sm:$0xff] %v285_v6  ;;  %v2335_v16 = vld [vmem:[#allocation2 + $0x20] sm:$0xff]  ;;  %993 = vmatpush.msrb.mxu0 %v460_v54  ;;  %v482_v54 = vld [vmem:[#allocation3 + $0x168] sm:$0xff] }
  0x42   : > { %302 = vst [vmem:[#allocation2 + $0x51] sm:$0xff] %v269_v11  ;;  %v349_v17 = vld [vmem:[#allocation2 + $0xf0] sm:$0xff]  ;;  %882 = vmatpush.msrb.mxu3 %v442_v1  ;;  %v2428_v6 = vld [vmem:[%s2230_s24 + $0xe0] sm:$0xff]  ;;  %v2495_v1 = vld [vmem:[%s2230_s24 + $0x78] sm:$0xff] }
  0x43   : > { %319 = vst [vmem:[#allocation2 + $0x121] sm:$0xff] %v286_v12  ;;  %v2352_v25 = vld [vmem:[#allocation2 + $0x30] sm:$0xff]  ;;  %994 = vmatpush.msrb.mxu0 %v459_v2  ;;  %v292_v10 = vsel %vm263_vm0, %v2428_v6, 0.0  ;;  %v455_v53 = vld [vmem:[#allocation3 + $0x90] sm:$0xff] }
  0x44   : > { %303 = vst [vmem:[#allocation2 + $0x61] sm:$0xff] %v270_v20  ;;  %v350_v26 = vld [vmem:[#allocation2 + $0xf8] sm:$0xff]  ;;  %v521_v11 = vld [vmem:[#allocation3 + $0x2a0] sm:$0xff]  ;;  %v479_v2 = vld [vmem:[#allocation3 + $0x150] sm:$0xff] }
  0x45   : > { %320 = vst [vmem:[#allocation2 + $0x129] sm:$0xff] %v287_v21  ;;  %2090 = vmatmul.msk.f32.gmra.mxu3 %vm263_vm0, %v2289_v52  ;;  %v2369_v34 = vld [vmem:[#allocation2 + $0x38] sm:$0xff]  ;;  %v523_v52 = vld [vmem:[#allocation3 + $0x2b0] sm:$0xff]  ;;  %v441_v12 = vld [vmem:[#allocation3 + $0x20] sm:$0xff]  ;;  %995 = vmatpush.msrb.mxu0 %v458_v13 }
  0x46   : > { %304 = vst [vmem:[#allocation2 + $0x69] sm:$0xff] %v271_v29  ;;  %v351_v35 = vld [vmem:[#allocation2 + $0x108] sm:$0xff]  ;;  %768 = vmatpush.msrb.mxu2 %v523_v52  ;;  %883 = vmatpush.msrb.mxu3 %v441_v12  ;;  %v438_v52 = vld [vmem:[#allocation3 + $0x8] sm:$0xff]  ;;  %v477_v12 = vld [vmem:[#allocation3 + $0x140] sm:$0xff] }
  0x47   : > { %2091 = vmatmul.msk.f32.gmra.mxu1 %vm263_vm0, %v2294_v56  ;;  %321 = vst [vmem:[#allocation2 + $0x139] sm:$0xff] %v288_v30  ;;  %v2386_v45 = vld [vmem:[#allocation2 + $0x48] sm:$0xff]  ;;  %996 = vmatpush.msrb.mxu0 %v457_v24  ;;  %v2462_v30 = vld [vmem:[%s2230_s24 + $0xf0] sm:$0xff]  ;;  %v474_v24 = vld [vmem:[#allocation3 + $0x128] sm:$0xff] }
  0x48   : > { %552 = vmatmul.f32.gmra.mxu0 %v2335_v16  ;;  %305 = vst [vmem:[#allocation2 + $0x79] sm:$0xff] %v272_v39  ;;  %v352_v46 = vld [vmem:[#allocation2 + $0x110] sm:$0xff]  ;;  %769 = vmatpush.msrb.mxu2 %v522_v62  ;;  %v2459_v29 = vld [vmem:[%s2230_s24 + $0x68] sm:$0xff]  ;;  %v294_v32 = vsel %vm263_vm0, %v2462_v30, 0.0 }
  0x49   : > { %603 = vmatmul.f32.gmra.mxu2 %v349_v17  ;;  %322 = vst [vmem:[#allocation2 + $0x141] sm:$0xff] %v289_v40  ;;  %v2403_v55 = vld [vmem:[#allocation2 + $0x50] sm:$0xff]  ;;  %v2442_v17 = vld [vmem:[%s2230_s24 + $0x60] sm:$0xff]  ;;  %884 = vmatpush.msrb.mxu3 %v440_v23  ;;  %v277_v31 = vsel %vm263_vm0, %v2459_v29, 0.0  ;;  %v484_v39 = vld [vmem:[#allocation3 + $0x178] sm:$0xff] }
  0x4a   : > { %306 = vst [vmem:[#allocation2 + $0x81] sm:$0xff] %v273_v49  ;;  %v353_v57 = vld [vmem:[#allocation2 + $0x120] sm:$0xff]  ;;  %770 = vmatpush.msrb.mxu2 %v521_v11  ;;  %v276_v20 = vsel %vm263_vm0, %v2442_v17, 0.0  ;;  %1098 = vmatpush.msrb.mxu1 %v484_v39  ;;  %v278_v49 = vsel %vm263_vm0, %v2476_v44, 0.0  ;;  %v480_v62 = vld [vmem:[#allocation3 + $0x158] sm:$0xff]  ;;  %v478_v11 = vld [vmem:[#allocation3 + $0x148] sm:$0xff] }
  0x4b   : > { %323 = vst [vmem:[#allocation2 + $0x151] sm:$0xff] %v290_v51  ;;  %v483_v40 = vld [vmem:[#allocation3 + $0x170] sm:$0xff]  ;;  %v518_v51 = vld [vmem:[#allocation3 + $0x288] sm:$0xff]  ;;  %v1242_v23 = vld [vmem:[#allocation3 + $0x3f8] sm:$0xff] }
  0x4c   : > { %307 = vst [vmem:[#allocation2 + $0x91] sm:$0xff] %v274_v60  ;;  %v354_v4 = vld [vmem:[#allocation2 + $0x128] sm:$0xff]  ;;  %771 = vmatpush.msrb.mxu2 %v520_v22  ;;  %1099 = vmatpush.msrb.mxu1 %v483_v40  ;;  %v469_v39 = vld [vmem:[#allocation3 + $0x100] sm:$0xff] }
  0x4d   : > { %2092 = vmatmul.msk.f32.gmra.mxu3 %vm263_vm0, %v2299_v59  ;;  %v2411_v59 = vld [vmem:[%s2230_s24 + $0xd8] sm:$0xff]  ;;  %325 = vst [vmem:[#allocation2 + $0x169] sm:$0xff] %v292_v10  ;;  %v2437_v14 = vld [vmem:[#allocation2 + $0x68] sm:$0xff] }
  0x4e   : > { %v291_v61 = vsel %vm263_vm0, %v2411_v59, 0.0  ;;  %v355_v15 = vld [vmem:[#allocation2 + $0x138] sm:$0xff]  ;;  %309 = vst [vmem:[#allocation2 + $0xa9] sm:$0xff] %v276_v20  ;;  %772 = vmatpush.msrb.mxu2 %v519_v33  ;;  %1100 = vmatpush.msrb.mxu1 %v482_v54  ;;  %v476_v20 = vld [vmem:[#allocation3 + $0x138] sm:$0xff] }
  0x4f   : > { %2093 = vmatmul.msk.f32.gmra.mxu1 %vm263_vm0, %v2304_v63  ;;  %324 = vst [vmem:[#allocation2 + $0x159] sm:$0xff] %v291_v61  ;;  %v454_v10 = vld [vmem:[#allocation3 + $0x88] sm:$0xff]  ;;  %v1226_v22 = vld [vmem:[#allocation3 + $0x378] sm:$0xff] }
  0x50   : > { %555 = vmatmul.f32.gmra.mxu0 %v2352_v25  ;;  %310 = vst [vmem:[#allocation2 + $0xb1] sm:$0xff] %v277_v31  ;;  %773 = vmatpush.msrb.mxu2 %v518_v51  ;;  %v472_v33 = vld [vmem:[#allocation3 + $0x118] sm:$0xff] }
  0x51   : > { %606 = vmatmul.f32.gmra.mxu2 %v350_v26  ;;  %v2454_v26 = vld [vmem:[#allocation2 + $0x78] sm:$0xff]  ;;  %327 = vst [vmem:[#allocation2 + $0x181] sm:$0xff] %v294_v32  ;;  %v2471_v41 = vld [vmem:[#allocation2 + $0x80] sm:$0xff] }
  0x52   : > { %v357_v42 = vld [vmem:[#allocation2 + $0x150] sm:$0xff]  ;;  %311 = vst [vmem:[#allocation2 + $0xc1] sm:$0xff] %v278_v49  ;;  %v1225_v49 = vld [vmem:[#allocation3 + $0x370] sm:$0xff] }
  0x53   : > { %v2488_v60 = vld [vmem:[#allocation2 + $0x90] sm:$0xff] }
  0x55   : > { %2094 = vmatmul.msk.f32.gmra.mxu3 %vm263_vm0, %v2310_v3  ;;  %v2420_v3 = vld [vmem:[#allocation2 + $0x60] sm:$0xff]  ;;  %v2513_v31 = vld [vmem:[#allocation2 + $0xa8] sm:$0xff] }
  0x56   : > { %v2490_v61 = vld [vmem:[#allocation2 + $0x158] sm:$0xff] }
  0x57   : > { %2095 = vmatmul.msk.f32.gmra.mxu1 %vm263_vm0, %v2323_v8  ;;  %v2523_v40 = vld [vmem:[#allocation2 + $0xb0] sm:$0xff] }
  0x58   : > { %558 = vmatmul.f32.gmra.mxu0 %v2369_v34 }
  0x59   : > { %609 = vmatmul.f32.gmra.mxu2 %v351_v35  ;;  %v439_v35 = vld [vmem:[#allocation3 + $0x10] sm:$0xff] }
  0x5a   : > { %885 = vmatpush.msrb.mxu3 %v439_v35  ;;  %v471_v35 = vld [vmem:[#allocation3 + $0x110] sm:$0xff] }
  0x5c   : > { %886 = vmatpush.msrb.mxu3 %v438_v52  ;;  %v329_v52 = vld [vmem:[#allocation2] sm:$0xff] }
  0x5d   : > { %2096 = vmatmul.msk.f32.gmra.mxu3 %vm263_vm0, %v2326_v9  ;;  %v275_v9 = vsel %vm263_vm0, %v2425_v5, 0.0 }
  0x5e   : > { %308 = vst [vmem:[#allocation2 + $0x99] sm:$0xff] %v275_v9  ;;  %v437_v9 = vld [vmem:[#allocation3] sm:$0xff] }
  0x5f   : > { %2097 = vmatmul.msk.f32.gmra.mxu1 %vm263_vm0, %v2340_v18  ;;  %887 = vmatpush.msrb.mxu3 %v437_v9 }
  0x60   : > { %561 = vmatmul.f32.gmra.mxu0 %v2386_v45 }
  0x61   : > { %612 = vmatmul.f32.gmra.mxu2 %v352_v46  ;;  %v2479_v46 = vld [vmem:[%s2230_s24 + $0xf8] sm:$0xff]  ;;  %1372 = vmatpush.msra.mxu3 %v1242_v23 }
  0x65   : > { %2098 = vmatmul.msk.f32.gmra.mxu3 %vm263_vm0, %v2343_v19  ;;  %v2445_v19 = vld [vmem:[%s2230_s24 + $0xe8] sm:$0xff]  ;;  %v2503_v13 = vld [vmem:[#allocation2 + $0x98] sm:$0xff] }
  0x66   : > { %v293_v21 = vsel %vm263_vm0, %v2445_v19, 0.0 }
  0x67   : > { %2099 = vmatmul.msk.f32.gmra.mxu1 %vm263_vm0, %v2357_v27  ;;  %326 = vst [vmem:[#allocation2 + $0x171] sm:$0xff] %v293_v21  ;;  %v475_v21 = vld [vmem:[#allocation3 + $0x130] sm:$0xff] }
  0x68   : > { %564 = vmatmul.f32.gmra.mxu0 %v2403_v55 }
  0x69   : > { %615 = vmatmul.f32.gmra.mxu2 %v353_v57  ;;  %v481_v57 = vld [vmem:[#allocation3 + $0x160] sm:$0xff] }
  0x6a   : > { %1101 = vmatpush.msrb.mxu1 %v481_v57  ;;  %v401_v57 = vld [vmem:[#allocation2 + $0x2] sm:$0xff] }
  0x6c   : > { %1102 = vmatpush.msrb.mxu1 %v480_v62 }
  0x6d   : > { %2100 = vmatmul.msk.f32.gmra.mxu3 %vm263_vm0, %v2360_v28  ;;  %v356_v28 = vld [vmem:[#allocation2 + $0x140] sm:$0xff] }
  0x6e   : > { %1103 = vmatpush.msrb.mxu1 %v479_v2  ;;  %v2515_v32 = vld [vmem:[#allocation2 + $0x170] sm:$0xff]  ;;  %v403_v2 = vld [vmem:[#allocation2 + $0x1a] sm:$0xff] }
  0x6f   : > { %2101 = vmatmul.msk.f32.gmra.mxu1 %vm263_vm0, %v2374_v36 }
  0x70   : > { %567 = vmatmul.f32.gmra.mxu0 %v2420_v3  ;;  %1104 = vmatpush.msrb.mxu1 %v478_v11  ;;  %v402_v11 = vld [vmem:[#allocation2 + $0xa] sm:$0xff] }
  0x71   : > { %618 = vmatmul.f32.gmra.mxu2 %v354_v4  ;;  %v517_v4 = vld [vmem:[#allocation3 + $0x280] sm:$0xff] }
  0x72   : > { %774 = vmatpush.msrb.mxu2 %v517_v4  ;;  %1105 = vmatpush.msrb.mxu1 %v477_v12  ;;  %v1240_v4 = vld [vmem:[#allocation3 + $0x3e8] sm:$0xff] }
  0x74   : > { %1106 = vmatpush.msrb.mxu1 %v476_v20  ;;  %1259 = vmatpush.msra.mxu2 %v1226_v22  ;;  %v365_v20 = vld [vmem:[#allocation2 + $0x1] sm:$0xff]  ;;  %v1256_v22 = vld [vmem:[#allocation3 + $0x468] sm:$0xff] }
  0x75   : > { %2102 = vmatmul.msk.f32.gmra.mxu3 %vm263_vm0, %v2377_v37  ;;  %v456_v37 = vld [vmem:[#allocation3 + $0x98] sm:$0xff] }
  0x76   : > { %997 = vmatpush.msrb.mxu0 %v456_v37  ;;  %1107 = vmatpush.msrb.mxu1 %v475_v21  ;;  %v470_v37 = vld [vmem:[#allocation3 + $0x108] sm:$0xff]  ;;  %v404_v21 = vld [vmem:[#allocation2 + $0x22] sm:$0xff] }
  0x77   : > { %2103 = vmatmul.msk.f32.gmra.mxu1 %vm263_vm0, %v2391_v47  ;;  %1260 = vmatpush.msra.mxu2 %v1225_v49 }
  0x78   : > { %570 = vmatmul.f32.gmra.mxu0 %v2437_v14  ;;  %1108 = vmatpush.msrb.mxu1 %v474_v24 }
  0x79   : > { %621 = vmatmul.f32.gmra.mxu2 %v355_v15  ;;  %998 = vmatpush.msrb.mxu0 %v455_v53  ;;  %v2505_v15 = vld [vmem:[#allocation2 + $0x168] sm:$0xff]  ;;  %v1257_v53 = vld [vmem:[#allocation3 + $0x470] sm:$0xff] }
  0x7b   : > { %999 = vmatpush.msrb.mxu0 %v454_v10 }
  0x7d   : > { %2104 = vmatmul.msk.f32.gmra.mxu3 %vm263_vm0, %v2394_v48  ;;  %v295_v48 = vsel %vm263_vm0, %v2479_v46, 0.0 }
  0x7e   : > { %328 = vst [vmem:[#allocation2 + $0x189] sm:$0xff] %v295_v48  ;;  %v1241_v48 = vld [vmem:[#allocation3 + $0x3f0] sm:$0xff] }
  0x7f   : > { %2105 = vmatmul.msk.f32.gmra.mxu1 %vm263_vm0, %v2408_v58  ;;  %1373 = vmatpush.msra.mxu3 %v1241_v48 }
  0x80   : > { %573 = vmatmul.f32.gmra.mxu0 %v2454_v26 }
  0x81   : > { %624 = vmatmul.f32.gmra.mxu2 %v356_v28  ;;  %v473_v28 = vld [vmem:[#allocation3 + $0x120] sm:$0xff]  ;;  %1374 = vmatpush.msra.mxu3 %v1240_v4 }
  0x82   : > { %1109 = vmatpush.msrb.mxu1 %v473_v28  ;;  %v2578_v4 = vld [vmem:[#allocation2 + $0x4a] sm:$0xff] }
  0x84   : > { %1110 = vmatpush.msrb.mxu1 %v472_v33  ;;  %v366_v33 = vld [vmem:[#allocation2 + $0x9] sm:$0xff] }
  0x85   : > { %2106 = vmatmul.msk.f32.gmra.mxu3 %vm263_vm0, %v2411_v59  ;;  %v279_v59 = vsel %vm263_vm0, %v2495_v1, 0.0  ;;  %v362_v51 = vld [vmem:[#allocation2 + $0x188] sm:$0xff] }
  0x86   : > { %312 = vst [vmem:[#allocation2 + $0xc9] sm:$0xff] %v279_v59  ;;  %1111 = vmatpush.msrb.mxu1 %v471_v35  ;;  %v1224_v59 = vld [vmem:[#allocation3 + $0x368] sm:$0xff] }
  0x87   : > { %2107 = vmatmul.msk.f32.gmra.mxu1 %vm263_vm0, %v2425_v5  ;;  %1261 = vmatpush.msra.mxu2 %v1224_v59  ;;  %v2556_v35 = vld [vmem:[#allocation2 + $0x32] sm:$0xff] }
  0x88   : > { %576 = vmatmul.f32.gmra.mxu0 %v2471_v41  ;;  %1112 = vmatpush.msrb.mxu1 %v470_v37  ;;  %v1223_v37 = vld [vmem:[#allocation3 + $0x360] sm:$0xff] }
  0x89   : > { %627 = vmatmul.f32.gmra.mxu2 %v357_v42  ;;  %v361_v42 = vld [vmem:[#allocation2 + $0x180] sm:$0xff] }
  0x8a   : > { %1113 = vmatpush.msrb.mxu1 %v469_v39  ;;  %v1239_v39 = vld [vmem:[#allocation3 + $0x3e0] sm:$0xff]  ;;  %1262 = vmatpush.msra.mxu2 %v1223_v37 }
  0x8b   : > { %1375 = vmatpush.msra.mxu3 %v1239_v39 }
  0x8d   : > { %2108 = vmatmul.msk.f32.gmra.mxu3 %vm263_vm0, %v2428_v6  ;;  %v453_v6 = vld [vmem:[#allocation3 + $0x80] sm:$0xff]  ;;  %v2537_v62 = vld [vmem:[#allocation2 + $0xc8] sm:$0xff] }
  0x8e   : > { %1000 = vmatpush.msrb.mxu0 %v453_v6 }
  0x8f   : > { %2109 = vmatmul.msk.f32.gmra.mxu1 %vm263_vm0, %v2442_v17 }
  0x90   : > { %579 = vmatmul.f32.gmra.mxu0 %v2488_v60 }
  0x91   : > { %630 = vmatmul.f32.gmra.mxu2 %v2490_v61 }
  0x95   : > { %2110 = vmatmul.msk.f32.gmra.mxu3 %vm263_vm0, %v2445_v19  ;;  %v1258_v19 = vld [vmem:[#allocation3 + $0x478] sm:$0xff] }
  0x96   : > { %1485 = vmatpush.msra.mxu0 %v1258_v19 }
  0x97   : > { %2111 = vmatmul.msk.f32.gmra.mxu1 %vm263_vm0, %v2459_v29 }
  0x98   : > { %582 = vmatmul.f32.gmra.mxu0 %v2503_v13 }
  0x99   : > { %633 = vmatmul.f32.gmra.mxu2 %v2505_v15  ;;  %1486 = vmatpush.msra.mxu0 %v1257_v53  ;;  %v1255_v53 = vld [vmem:[#allocation3 + $0x460] sm:$0xff] }
  0x9b   : > { %1487 = vmatpush.msra.mxu0 %v1256_v22 }
  0x9d   : > { %2112 = vmatmul.msk.f32.gmra.mxu3 %vm263_vm0, %v2462_v30  ;;  %v2530_v30 = vld [vmem:[#allocation2 + $0xc0] sm:$0xff]  ;;  %1488 = vmatpush.msra.mxu0 %v1255_v53 }
  0x9e   : > { %v1237_v53 = vld [vmem:[#allocation3 + $0x3d0] sm:$0xff] }
  0x9f   : > { %2113 = vmatmul.msk.f32.gmra.mxu1 %vm263_vm0, %v2476_v44 }
  0xa0   : > { %585 = vmatmul.f32.gmra.mxu0 %v2513_v31 }
  0xa1   : > { %636 = vmatmul.f32.gmra.mxu2 %v2515_v32 }
  0xa5   : > { %2114 = vmatmul.msk.f32.gmra.mxu3 %vm263_vm0, %v2479_v46 }
  0xa7   : > { %2115 = vmatmul.msk.f32.gmra.mxu1 %vm263_vm0, %v2495_v1 }
  0xa8   : > { %588 = vmatmul.f32.gmra.mxu0 %v2523_v40 }
  0xa9   : > { %639 = vmatmul.f32.gmra.mxu2 %v361_v42 }
  0xac   : > { %v2535_v54 = vpop.f32.mrf.mxu1 }
  0xad   : > { %888 = vmatmul.f32.vlgmr.msrb.gmra.mxu3 %v329_v52 }
  0xaf   : > { %1114 = vmatmul.f32.vlgmr.msrb.gmra.mxu1 %v401_v57  ;;  %v2542_v9 = vpop.f32.mrf.mxu2 }
  0xb0   : > { %591 = vmatmul.f32.gmra.mxu0 %v2530_v30  ;;  %v2539_v46 = vpop.f32.mrf.mxu3 }
  0xb1   : > { %642 = vmatmul.f32.gmra.mxu2 %v362_v51  ;;  %v2566_v51 = vld [vmem:[#allocation2 + $0x3a] sm:$0xff] }
  0xb4   : > { %v2545_v10 = vpop.f32.mrf.mxu1 }
  0xb5   : > { %891 = vmatmul.f32.gmra.mxu3 %v2177_v0 }
  0xb7   : > { %1117 = vmatmul.f32.gmra.mxu1 %v402_v11 }
  0xb8   : > { %594 = vmatmul.f32.gmra.mxu0 %v2537_v62  ;;  %v714_v6 = vpop.f32.mrf.mxu3 }
  0xb9   : > { %775 = vmatmul.f32.vlgmr.msrb.gmra.mxu2 %v403_v2 }
  0xbc   : > { %v2550_v23 = vpop.f32.mrf.mxu1 }
  0xbd   : > { %v2547_v12 = vpop.f32.mrf.mxu0  ;;  %894 = vmatmul.f32.gmra.mxu3 %v2320_v7 }
  0xbf   : > { %1120 = vmatmul.f32.gmra.mxu1 %v403_v2 }
  0xc0   : > { %1001 = vmatmul.f32.vlgmr.msrb.gmra.mxu0 %v365_v20  ;;  %v717_v19 = vpop.f32.mrf.mxu3  ;;  %v1238_v20 = vld [vmem:[#allocation3 + $0x3d8] sm:$0xff] }
  0xc1   : > { %778 = vmatmul.f32.gmra.mxu2 %v404_v21  ;;  %1376 = vmatpush.msra.mxu3 %v1238_v20  ;;  %v2617_v20 = vld [vmem:[#allocation2 + $0x6a] sm:$0xff] }
  0xc2   : > { %3328 = vst [vmem:[#allocation8_spill] sm:$0xff] %v2617_v20 }
  0xc3   : > { %1377 = vmatpush.msra.mxu3 %v1237_v53  ;;  %v1236_v53 = vld [vmem:[#allocation3 + $0x3c8] sm:$0xff] }
  0xc4   : > { %v601_v24 = vpop.f32.mrf.mxu2  ;;  %v2560_v7 = vpop.f32.mrf.mxu1 }
  0xc5   : > { %v2552_v28 = vadd.f32 %v714_v6, %v601_v24  ;;  %v2554_v0 = vpop.f32.mrf.mxu0  ;;  %897 = vmatmul.f32.gmra.mxu3 %v2335_v16  ;;  %v2591_v24 = vld [vmem:[#allocation2 + $0x52] sm:$0xff] }
  0xc6   : > { %1378 = vmatpush.msra.mxu3 %v1236_v53 }
  0xc7   : > { %1123 = vmatmul.f32.gmra.mxu1 %v404_v21 }
  0xc8   : > { %1004 = vmatmul.f32.gmra.mxu0 %v366_v33  ;;  %v720_v52 = vpop.f32.mrf.mxu3 }
  0xc9   : > { %781 = vmatmul.f32.gmra.mxu2 %v2556_v35 }
  0xcc   : > { %v604_v42 = vpop.f32.mrf.mxu2  ;;  %v2572_v16 = vpop.f32.mrf.mxu1 }
  0xcd   : > { %v2562_v49 = vadd.f32 %v717_v19, %v604_v42  ;;  %v2564_v48 = vpop.f32.mrf.mxu0  ;;  %900 = vmatmul.f32.gmra.mxu3 %v2352_v25  ;;  %v2604_v42 = vld [vmem:[#allocation2 + $0x62] sm:$0xff] }
  0xcf   : > { %1126 = vmatmul.f32.gmra.mxu1 %v2556_v35 }
  0xd0   : > { %2116 = vmatmul.msk.f32.gmra.mxu0 %vm263_vm0, %v2262_v38  ;;  %v723_v11 = vpop.f32.mrf.mxu3  ;;  %v1222_v38 = vld [vmem:[#allocation3 + $0x358] sm:$0xff] }
  0xd1   : > { %784 = vmatmul.f32.gmra.mxu2 %v2566_v51 }
  0xd2   : > { %1263 = vmatpush.msra.mxu2 %v1222_v38 }
  0xd4   : > { %v607_v57 = vpop.f32.mrf.mxu2  ;;  %v2585_v25 = vpop.f32.mrf.mxu1 }
  0xd5   : > { %v2574_v2 = vadd.f32 %v720_v52, %v607_v57  ;;  %v2576_v59 = vpop.f32.mrf.mxu0  ;;  %903 = vmatmul.f32.gmra.mxu3 %v2369_v34 }
  0xd7   : > { %1129 = vmatmul.f32.gmra.mxu1 %v2566_v51 }
  0xd8   : > { %2117 = vmatmul.msk.f32.gmra.mxu0 %vm263_vm0, %v2270_v43  ;;  %v726_v33 = vpop.f32.mrf.mxu3  ;;  %v1254_v43 = vld [vmem:[#allocation3 + $0x458] sm:$0xff] }
  0xd9   : > { %787 = vmatmul.f32.gmra.mxu2 %v2578_v4  ;;  %1489 = vmatpush.msra.mxu0 %v1254_v43 }
  0xdc   : > { %v610_v21 = vpop.f32.mrf.mxu2  ;;  %v2598_v34 = vpop.f32.mrf.mxu1 }
  0xdd   : > { %v2587_v6 = vadd.f32 %v723_v11, %v610_v21  ;;  %v2589_v22 = vpop.f32.mrf.mxu0  ;;  %906 = vmatmul.f32.gmra.mxu3 %v2386_v45 }
  0xdf   : > { %1132 = vmatmul.f32.gmra.mxu1 %v2578_v4 }
  0xe0   : > { %2118 = vmatmul.msk.f32.gmra.mxu0 %vm263_vm0, %v2283_v50  ;;  %v729_v52 = vpop.f32.mrf.mxu3  ;;  %v1221_v50 = vld [vmem:[#allocation3 + $0x350] sm:$0xff] }
  0xe1   : > { %790 = vmatmul.f32.gmra.mxu2 %v2591_v24 }
  0xe2   : > { %1264 = vmatpush.msra.mxu2 %v1221_v50 }
  0xe4   : > { %v613_v19 = vpop.f32.mrf.mxu2  ;;  %v2611_v45 = vpop.f32.mrf.mxu1 }
  0xe5   : > { %v2600_v37 = vadd.f32 %v726_v33, %v613_v19  ;;  %v2602_v39 = vpop.f32.mrf.mxu0  ;;  %909 = vmatmul.f32.gmra.mxu3 %v2403_v55 }
  0xe7   : > { %3326 = vst [vmem:[#allocation6_spill] sm:$0xff] %v2600_v37  ;;  %1135 = vmatmul.f32.gmra.mxu1 %v2591_v24 }
  0xe8   : > { %2119 = vmatmul.msk.f32.gmra.mxu0 %vm263_vm0, %v2294_v56  ;;  %v732_v21 = vpop.f32.mrf.mxu3  ;;  %v1253_v56 = vld [vmem:[#allocation3 + $0x450] sm:$0xff] }
  0xe9   : > { %793 = vmatmul.f32.gmra.mxu2 %v2604_v42  ;;  %1490 = vmatpush.msra.mxu0 %v1253_v56 }
  0xec   : > { %v616_v57 = vpop.f32.mrf.mxu2  ;;  %v2624_v55 = vpop.f32.mrf.mxu1 }
  0xed   : > { %v2613_v11 = vadd.f32 %v729_v52, %v616_v57  ;;  %v2615_v38 = vpop.f32.mrf.mxu0  ;;  %912 = vmatmul.f32.gmra.mxu3 %v2420_v3  ;;  %v2630_v52 = vld [vmem:[#allocation2 + $0x7a] sm:$0xff] }
  0xee   : > { %3330 = vst [vmem:[#allocation10_spill] sm:$0xff] %v2630_v52 }
  0xef   : > { %3327 = vst [vmem:[#allocation7_spill] sm:$0xff] %v2613_v11  ;;  %1138 = vmatmul.f32.gmra.mxu1 %v2604_v42  ;;  %v2669_v11 = vld [vmem:[#allocation2 + $0x9a] sm:$0xff] }
  0xf0   : > { %2120 = vmatmul.msk.f32.gmra.mxu0 %vm263_vm0, %v2304_v63  ;;  %v735_v50 = vpop.f32.mrf.mxu3  ;;  %v1220_v63 = vld [vmem:[#allocation3 + $0x348] sm:$0xff]  ;;  %3336 = vst [vmem:[#allocation16_spill] sm:$0xff] %v2669_v11 }
  0xf1   : > { %796 = vmatmul.f32.gmra.mxu2 %v2617_v20 }
  0xf2   : > { %1265 = vmatpush.msra.mxu2 %v1220_v63 }
  0xf4   : > { %v619_v33 = vpop.f32.mrf.mxu2  ;;  %v2637_v3 = vpop.f32.mrf.mxu1 }
  0xf5   : > { %v2626_v43 = vadd.f32 %v732_v21, %v619_v33  ;;  %v2628_v19 = vpop.f32.mrf.mxu0  ;;  %915 = vmatmul.f32.gmra.mxu3 %v2437_v14  ;;  %v2643_v33 = vld [vmem:[#allocation2 + $0x82] sm:$0xff] }
  0xf6   : > { %3332 = vst [vmem:[#allocation12_spill] sm:$0xff] %v2643_v33 }
  0xf7   : > { %3329 = vst [vmem:[#allocation9_spill] sm:$0xff] %v2626_v43  ;;  %1141 = vmatmul.f32.gmra.mxu1 %v2617_v20 }
  0xf8   : > { %2121 = vmatmul.msk.f32.gmra.mxu0 %vm263_vm0, %v2323_v8  ;;  %v738_v43 = vpop.f32.mrf.mxu3  ;;  %v1252_v8 = vld [vmem:[#allocation3 + $0x448] sm:$0xff] }
  0xf9   : > { %799 = vmatmul.f32.gmra.mxu2 %v2630_v52  ;;  %1491 = vmatpush.msra.mxu0 %v1252_v8  ;;  %v1235_v8 = vld [vmem:[#allocation3 + $0x3c0] sm:$0xff] }
  0xfa   : > { %1379 = vmatpush.msra.mxu3 %v1235_v8 }
  0xfc   : > { %v622_v57 = vpop.f32.mrf.mxu2  ;;  %v2650_v14 = vpop.f32.mrf.mxu1 }
  0xfd   : > { %v2639_v21 = vadd.f32 %v735_v50, %v622_v57  ;;  %v2641_v56 = vpop.f32.mrf.mxu0  ;;  %918 = vmatmul.f32.gmra.mxu3 %v2454_v26  ;;  %v2656_v57 = vld [vmem:[#allocation2 + $0x92] sm:$0xff] }
  0xfe   : > { %3334 = vst [vmem:[#allocation14_spill] sm:$0xff] %v2656_v57 }
  0xff   : > { %3331 = vst [vmem:[#allocation11_spill] sm:$0xff] %v2639_v21  ;;  %1144 = vmatmul.f32.gmra.mxu1 %v2630_v52 }
 0x100   : > { %2122 = vmatmul.msk.f32.gmra.mxu0 %vm263_vm0, %v2340_v18  ;;  %v741_v21 = vpop.f32.mrf.mxu3  ;;  %v1219_v18 = vld [vmem:[#allocation3 + $0x340] sm:$0xff] }
 0x101   : > { %802 = vmatmul.f32.gmra.mxu2 %v2643_v33 }
 0x102   : > { %1266 = vmatpush.msra.mxu2 %v1219_v18 }
 0x104   : > { %v625_v50 = vpop.f32.mrf.mxu2  ;;  %v2663_v26 = vpop.f32.mrf.mxu1 }
 0x105   : > { %v2652_v63 = vadd.f32 %v738_v43, %v625_v50  ;;  %v2654_v53 = vpop.f32.mrf.mxu0  ;;  %921 = vmatmul.f32.gmra.mxu3 %v2471_v41 }
 0x107   : > { %3333 = vst [vmem:[#allocation13_spill] sm:$0xff] %v2652_v63  ;;  %1147 = vmatmul.f32.gmra.mxu1 %v2643_v33  ;;  %v2695_v33 = vld [vmem:[#allocation2 + $0xb2] sm:$0xff] }
 0x108   : > { %2123 = vmatmul.msk.f32.gmra.mxu0 %vm263_vm0, %v2357_v27  ;;  %v744_v52 = vpop.f32.mrf.mxu3  ;;  %v1251_v27 = vld [vmem:[#allocation3 + $0x440] sm:$0xff]  ;;  %3340 = vst [vmem:[#allocation20_spill] sm:$0xff] %v2695_v33 }
 0x109   : > { %805 = vmatmul.f32.gmra.mxu2 %v2656_v57  ;;  %1492 = vmatpush.msra.mxu0 %v1251_v27  ;;  %v1234_v27 = vld [vmem:[#allocation3 + $0x3b8] sm:$0xff] }
 0x10a   : > { %1380 = vmatpush.msra.mxu3 %v1234_v27 }
 0x10c   : > { %v628_v43 = vpop.f32.mrf.mxu2  ;;  %v2676_v41 = vpop.f32.mrf.mxu1 }
 0x10d   : > { %v2665_v50 = vadd.f32 %v741_v21, %v628_v43  ;;  %v2667_v63 = vpop.f32.mrf.mxu0  ;;  %924 = vmatmul.f32.gmra.mxu3 %v2488_v60  ;;  %v2682_v43 = vld [vmem:[#allocation2 + $0xaa] sm:$0xff] }
 0x10e   : > { %3338 = vst [vmem:[#allocation18_spill] sm:$0xff] %v2682_v43 }
 0x10f   : > { %3335 = vst [vmem:[#allocation15_spill] sm:$0xff] %v2665_v50  ;;  %1150 = vmatmul.f32.gmra.mxu1 %v2656_v57 }
 0x110   : > { %2124 = vmatmul.msk.f32.gmra.mxu0 %vm263_vm0, %v2374_v36  ;;  %v747_v50 = vpop.f32.mrf.mxu3  ;;  %v1218_v36 = vld [vmem:[#allocation3 + $0x338] sm:$0xff] }
 0x111   : > { %808 = vmatmul.f32.gmra.mxu2 %v2669_v11 }
 0x112   : > { %1267 = vmatpush.msra.mxu2 %v1218_v36 }
 0x114   : > { %v631_v21 = vpop.f32.mrf.mxu2  ;;  %v2689_v60 = vpop.f32.mrf.mxu1 }
 0x115   : > { %v2678_v18 = vadd.f32 %v744_v52, %v631_v21  ;;  %v2680_v8 = vpop.f32.mrf.mxu0  ;;  %927 = vmatmul.f32.gmra.mxu3 %v2503_v13 }
 0x117   : > { %3337 = vst [vmem:[#allocation17_spill] sm:$0xff] %v2678_v18  ;;  %1153 = vmatmul.f32.gmra.mxu1 %v2669_v11  ;;  %v2724_v11 = vld [vmem:[#allocation2 + $0xca] sm:$0xff] }
 0x118   : > { %2125 = vmatmul.msk.f32.gmra.mxu0 %vm263_vm0, %v2391_v47  ;;  %v750_v57 = vpop.f32.mrf.mxu3  ;;  %v1250_v47 = vld [vmem:[#allocation3 + $0x438] sm:$0xff] }
 0x119   : > { %811 = vmatmul.f32.gmra.mxu2 %v2682_v43  ;;  %1493 = vmatpush.msra.mxu0 %v1250_v47 }
 0x11c   : > { %v634_v52 = vpop.f32.mrf.mxu2  ;;  %v2702_v13 = vpop.f32.mrf.mxu1 }
 0x11d   : > { %v2691_v21 = vadd.f32 %v747_v50, %v634_v52  ;;  %v2693_v18 = vpop.f32.mrf.mxu0  ;;  %930 = vmatmul.f32.gmra.mxu3 %v2513_v31  ;;  %v2708_v52 = vld [vmem:[#allocation2 + $0xc2] sm:$0xff] }
 0x11e   : > { %3342 = vst [vmem:[#allocation22_spill] sm:$0xff] %v2708_v52  ;;  %v1217_v31 = vld [vmem:[#allocation3 + $0x330] sm:$0xff] }
 0x11f   : > { %3339 = vst [vmem:[#allocation19_spill] sm:$0xff] %v2691_v21  ;;  %1156 = vmatmul.f32.gmra.mxu1 %v2682_v43  ;;  %1268 = vmatpush.msra.mxu2 %v1217_v31 }
 0x120   : > { %2126 = vmatmul.msk.f32.gmra.mxu0 %vm263_vm0, %v2408_v58  ;;  %v753_v21 = vpop.f32.mrf.mxu3  ;;  %v1677_v58 = vld [vmem:[%s3309_s2 + $0x78] sm:$0xff] }
 0x121   : > { %814 = vmatmul.f32.gmra.mxu2 %v2695_v33  ;;  %1678 = vmatpush.msra.mxu1 %v1677_v58 }
 0x124   : > { %v637_v50 = vpop.f32.mrf.mxu2  ;;  %v2718_v47 = vpop.f32.mrf.mxu1 }
 0x125   : > { %v2704_v36 = vadd.f32 %v750_v57, %v637_v50  ;;  %v2706_v27 = vpop.f32.mrf.mxu0  ;;  %v1233_v57 = vld [vmem:[#allocation3 + $0x3b0] sm:$0xff]  ;;  %933 = vmatmul.f32.gmra.mxu3 %v2523_v40 }
 0x126   : > { %1381 = vmatpush.msra.mxu3 %v1233_v57  ;;  %v2735_v57 = vld [vmem:[#allocation2 + $0xda] sm:$0xff] }
 0x127   : > { %3341 = vst [vmem:[#allocation21_spill] sm:$0xff] %v2704_v36  ;;  %1159 = vmatmul.f32.gmra.mxu1 %v2695_v33  ;;  %v2747_v33 = vld [vmem:[#allocation2 + $0xe2] sm:$0xff] }
 0x128   : > { %2127 = vmatmul.msk.f32.gmra.mxu0 %vm263_vm0, %v2425_v5  ;;  %v756_v20 = vpop.f32.mrf.mxu3  ;;  %v1249_v5 = vld [vmem:[#allocation3 + $0x430] sm:$0xff] }
 0x129   : > { %817 = vmatmul.f32.gmra.mxu2 %v2708_v52  ;;  %1494 = vmatpush.msra.mxu0 %v1249_v5  ;;  %v664_v5 = vadd.f32 %v2535_v54, %v2547_v12  ;;  %v667_v54 = vadd.f32 %v2545_v10, %v2554_v0  ;;  %v2757_v12 = vld [vmem:[#allocation2 + $0xd8] sm:$0xff]  ;;  %v1675_v10 = vld [vmem:[%s3309_s2 + $0x68] sm:$0xff] }
 0x12c   : > { %v640_v50 = vpop.f32.mrf.mxu2  ;;  %v1115_v40 = vpop.f32.mrf.mxu1 }
 0x12d   : > { %v2720_v36 = vadd.f32 %v753_v21, %v640_v50  ;;  %v2722_v43 = vpop.f32.mrf.mxu0  ;;  %936 = vmatmul.f32.gmra.mxu3 %v2530_v30  ;;  %v1216_v30 = vld [vmem:[#allocation3 + $0x328] sm:$0xff] }
 0x12e   : > { %1269 = vmatpush.msra.mxu2 %v1216_v30  ;;  %v1248_v30 = vld [vmem:[#allocation3 + $0x428] sm:$0xff] }
 0x12f   : > { %3343 = vst [vmem:[#allocation23_spill] sm:$0xff] %v2720_v36  ;;  %1162 = vmatmul.f32.gmra.mxu1 %v2708_v52  ;;  %1495 = vmatpush.msra.mxu0 %v1248_v30 }
 0x130   : > { %2128 = vmatmul.msk.f32.gmra.mxu0 %vm263_vm0, %v2442_v17  ;;  %v889_v50 = vpop.f32.mrf.mxu3  ;;  %v1676_v17 = vld [vmem:[%s3309_s2 + $0x70] sm:$0xff] }
 0x131   : > { %820 = vmatmul.f32.gmra.mxu2 %v2724_v11  ;;  %1679 = vmatpush.msra.mxu1 %v1676_v17 }
 0x133   : > { %1680 = vmatpush.msra.mxu1 %v1675_v10  ;;  %v2779_v10 = vld [vmem:[#allocation2 + $0xd9] sm:$0xff] }
 0x134   : > { %v643_v58 = vpop.f32.mrf.mxu2 }
 0x135   : > { %v2731_v21 = vadd.f32 %v756_v20, %v643_v58  ;;  %v2733_v31 = vpop.f32.mrf.mxu0  ;;  %v1232_v20 = vld [vmem:[#allocation3 + $0x3a8] sm:$0xff]  ;;  %939 = vmatmul.f32.gmra.mxu3 %v2537_v62 }
 0x136   : > { %1382 = vmatpush.msra.mxu3 %v1232_v20 }
 0x137   : > { %3344 = vst [vmem:[#allocation24_spill] sm:$0xff] %v2731_v21  ;;  %v1118_v21 = vpop.f32.mrf.mxu1  ;;  %1165 = vmatmul.f32.gmra.mxu1 %v2724_v11 }
 0x138   : > { %2129 = vmatmul.msk.f32.gmra.mxu0 %vm263_vm0, %v2459_v29  ;;  %v892_v37 = vpop.f32.mrf.mxu3 }
 0x139   : > { %823 = vmatmul.f32.gmra.mxu2 %v2735_v57 }
 0x13c   : > { %v776_v58 = vpop.f32.mrf.mxu2 }
 0x13d   : > { %v777_v36 = vadd.f32 %v776_v58, %v664_v5  ;;  %v1002_v52 = vpop.f32.mrf.mxu0  ;;  %942 = vmatmul.f32.gmra.mxu3 %v2757_v12 }
 0x13f   : > { %v890_v29 = vadd.f32 %v889_v50, %v777_v36  ;;  %v2760_v50 = vld [vmem:[#allocation2 + $0xf2] sm:$0xff]  ;;  %1168 = vmatmul.f32.gmra.mxu1 %v2735_v57 }
 0x140   : > { %2130 = vmatmul.msk.f32.gmra.mxu0 %vm263_vm0, %v2476_v44  ;;  %v895_v44 = vpop.f32.mrf.mxu3 }
 0x141   : > { %v1003_v17 = vadd.f32 %v1002_v52, %v890_v29  ;;  %826 = vmatmul.f32.gmra.mxu2 %v2747_v33  ;;  %v1121_v52 = vpop.f32.mrf.mxu1  ;;  %v1231_v29 = vld [vmem:[#allocation3 + $0x3a0] sm:$0xff] }
 0x142   : > { %1383 = vmatpush.msra.mxu3 %v1231_v29  ;;  %v2787_v29 = vld [vmem:[#allocation2 + $0xf0] sm:$0xff] }
 0x143   : > { %v2755_v62 = vadd.f32 %v1115_v40, %v1003_v17  ;;  %v1215_v40 = vld [vmem:[#allocation3 + $0x320] sm:$0xff]  ;;  %v670_v17 = vadd.f32 %v2550_v23, %v2564_v48 }
 0x144   : > { %v779_v20 = vpop.f32.mrf.mxu2  ;;  %1270 = vmatpush.msra.mxu2 %v1215_v40 }
 0x145   : > { %3345 = vst [vmem:[#allocation25_spill] sm:$0xff] %v2755_v62  ;;  %v780_v5 = vadd.f32 %v779_v20, %v667_v54  ;;  %v1005_v36 = vpop.f32.mrf.mxu0 }
 0x147   : > { %v893_v58 = vadd.f32 %v892_v37, %v780_v5  ;;  %v2773_v37 = vld [vmem:[#allocation2 + $0xe0] sm:$0xff]  ;;  %1171 = vmatmul.f32.gmra.mxu1 %v2747_v33 }
 0x148   : > { %2131 = vmatmul.msk.f32.gmra.mxu0 %vm263_vm0, %v2495_v1  ;;  %945 = vmatmul.f32.gmra.mxu3 %v2773_v37  ;;  %v2776_v5 = vld [vmem:[#allocation2 + $0xfa] sm:$0xff] }
 0x149   : > { %v1006_v0 = vadd.f32 %v1005_v36, %v893_v58  ;;  %829 = vmatmul.f32.gmra.mxu2 %v2760_v50  ;;  %v898_v36 = vpop.f32.mrf.mxu3  ;;  %v1124_v23 = vpop.f32.mrf.mxu1 }
 0x14b   : > { %v2771_v30 = vadd.f32 %v1118_v21, %v1006_v0  ;;  %v1247_v21 = vld [vmem:[#allocation3 + $0x420] sm:$0xff]  ;;  %v673_v0 = vadd.f32 %v2560_v7, %v2576_v59  ;;  %v2796_v7 = vld [vmem:[#allocation2 + $0xe1] sm:$0xff] }
 0x14c   : > { %v782_v54 = vpop.f32.mrf.mxu2  ;;  %1496 = vmatpush.msra.mxu0 %v1247_v21 }
 0x14d   : > { %3346 = vst [vmem:[#allocation26_spill] sm:$0xff] %v2771_v30  ;;  %v783_v20 = vadd.f32 %v782_v54, %v670_v17  ;;  %v1008_v1 = vpop.f32.mrf.mxu0 }
 0x14f   : > { %v896_v58 = vadd.f32 %v895_v44, %v783_v20  ;;  %v2790_v20 = vld [vmem:[#allocation2 + $0x10a] sm:$0xff]  ;;  %1174 = vmatmul.f32.gmra.mxu1 %v2760_v50 }
 0x150   : > { %1055 = vmatmul.f32.gmra.mxu0 %v2779_v10  ;;  %948 = vmatmul.f32.gmra.mxu3 %v2787_v29  ;;  %3348 = vst [vmem:[#allocation28_spill] sm:$0xff] %v2790_v20 }
 0x151   : > { %v1009_v48 = vadd.f32 %v1008_v1, %v896_v58  ;;  %832 = vmatmul.f32.gmra.mxu2 %v2776_v5  ;;  %v901_v30 = vpop.f32.mrf.mxu3  ;;  %v1674_v58 = vld [vmem:[%s3309_s2 + $0x60] sm:$0xff]  ;;  %v1127_v21 = vpop.f32.mrf.mxu1 }
 0x152   : > { %1681 = vmatpush.msra.mxu1 %v1674_v58 }
 0x153   : > { %v2785_v40 = vadd.f32 %v1121_v52, %v1009_v48  ;;  %v1214_v52 = vld [vmem:[#allocation3 + $0x318] sm:$0xff] }
 0x154   : > { %v785_v44 = vpop.f32.mrf.mxu2  ;;  %v1230_v48 = vld [vmem:[#allocation3 + $0x398] sm:$0xff]  ;;  %1271 = vmatpush.msra.mxu2 %v1214_v52  ;;  %v2810_v52 = vld [vmem:[#allocation2 + $0xf1] sm:$0xff] }
 0x155   : > { %3347 = vst [vmem:[#allocation27_spill] sm:$0xff] %v2785_v40  ;;  %v786_v17 = vadd.f32 %v785_v44, %v673_v0  ;;  %v1011_v54 = vpop.f32.mrf.mxu0  ;;  %1384 = vmatpush.msra.mxu3 %v1230_v48  ;;  %v2804_v44 = vld [vmem:[#allocation2 + $0xf8] sm:$0xff]  ;;  %v2818_v48 = vld [vmem:[#allocation2 + $0x108] sm:$0xff] }
 0x157   : > { %v899_v1 = vadd.f32 %v898_v36, %v786_v17  ;;  %v676_v36 = vadd.f32 %v2572_v16, %v2589_v22  ;;  %1177 = vmatmul.f32.gmra.mxu1 %v2776_v5  ;;  %v1246_v22 = vld [vmem:[#allocation3 + $0x418] sm:$0xff] }
 0x158   : > { %1058 = vmatmul.f32.gmra.mxu0 %v2796_v7  ;;  %951 = vmatmul.f32.gmra.mxu3 %v2804_v44 }
 0x159   : > { %v1012_v59 = vadd.f32 %v1011_v54, %v899_v1  ;;  %835 = vmatmul.f32.gmra.mxu2 %v2790_v20  ;;  %v2807_v54 = vld [vmem:[#allocation2 + $0x112] sm:$0xff]  ;;  %v904_v1 = vpop.f32.mrf.mxu3  ;;  %1497 = vmatpush.msra.mxu0 %v1246_v22  ;;  %v1229_v22 = vld [vmem:[#allocation3 + $0x390] sm:$0xff] }
 0x15a   : > { %3350 = vst [vmem:[#allocation30_spill] sm:$0xff] %v2807_v54  ;;  %1385 = vmatpush.msra.mxu3 %v1229_v22  ;;  %v2841_v22 = vld [vmem:[#allocation2 + $0x109] sm:$0xff] }
 0x15b   : > { %v2802_v0 = vadd.f32 %v1124_v23, %v1012_v59  ;;  %v679_v23 = vadd.f32 %v2585_v25, %v2602_v39  ;;  %v1673_v25 = vld [vmem:[%s3309_s2 + $0x58] sm:$0xff] }
 0x15c   : > { %v788_v17 = vpop.f32.mrf.mxu2  ;;  %v2827_v39 = vld [vmem:[#allocation2 + $0xf9] sm:$0xff]  ;;  %1682 = vmatpush.msra.mxu1 %v1673_v25  ;;  %v2838_v25 = vld [vmem:[#allocation2 + $0x12a] sm:$0xff] }
 0x15d   : > { %3349 = vst [vmem:[#allocation29_spill] sm:$0xff] %v2802_v0  ;;  %v789_v40 = vadd.f32 %v788_v17, %v676_v36  ;;  %v1014_v58 = vpop.f32.mrf.mxu0  ;;  %v2821_v0 = vld [vmem:[#allocation2 + $0x122] sm:$0xff] }
 0x15e   : > { %3352 = vst [vmem:[#allocation32_spill] sm:$0xff] %v2821_v0 }
 0x15f   : > { %v902_v62 = vadd.f32 %v901_v30, %v789_v40  ;;  %v1130_v30 = vpop.f32.mrf.mxu1  ;;  %1180 = vmatmul.f32.gmra.mxu1 %v2790_v20 }
 0x160   : > { %1061 = vmatmul.f32.gmra.mxu0 %v2810_v52  ;;  %954 = vmatmul.f32.gmra.mxu3 %v2818_v48 }
 0x161   : > { %v1015_v16 = vadd.f32 %v1014_v58, %v902_v62  ;;  %838 = vmatmul.f32.gmra.mxu2 %v2807_v54  ;;  %v907_v62 = vpop.f32.mrf.mxu3 }
 0x163   : > { %v2816_v59 = vadd.f32 %v1127_v21, %v1015_v16  ;;  %v1213_v16 = vld [vmem:[#allocation3 + $0x310] sm:$0xff] }
 0x164   : > { %v791_v36 = vpop.f32.mrf.mxu2  ;;  %1272 = vmatpush.msra.mxu2 %v1213_v16 }
 0x165   : > { %3351 = vst [vmem:[#allocation31_spill] sm:$0xff] %v2816_v59  ;;  %v792_v40 = vadd.f32 %v791_v36, %v679_v23  ;;  %v1017_v17 = vpop.f32.mrf.mxu0  ;;  %v682_v23 = vadd.f32 %v2598_v34, %v2615_v38  ;;  %v2835_v36 = vld [vmem:[#allocation2 + $0x110] sm:$0xff]  ;;  %v1245_v38 = vld [vmem:[#allocation3 + $0x410] sm:$0xff] }
 0x166   : > { %1498 = vmatpush.msra.mxu0 %v1245_v38  ;;  %v1228_v38 = vld [vmem:[#allocation3 + $0x388] sm:$0xff] }
 0x167   : > { %v905_v58 = vadd.f32 %v904_v1, %v792_v40  ;;  %1183 = vmatmul.f32.gmra.mxu1 %v2807_v54  ;;  %1386 = vmatpush.msra.mxu3 %v1228_v38 }
 0x168   : > { %1064 = vmatmul.f32.gmra.mxu0 %v2827_v39  ;;  %957 = vmatmul.f32.gmra.mxu3 %v2835_v36 }
 0x169   : > { %v1018_v21 = vadd.f32 %v1017_v17, %v905_v58  ;;  %841 = vmatmul.f32.gmra.mxu2 %v2821_v0  ;;  %v1133_v17 = vpop.f32.mrf.mxu1  ;;  %v910_v58 = vpop.f32.mrf.mxu3 }
 0x16b   : > { %v2833_v1 = vadd.f32 %v1130_v30, %v1018_v21  ;;  %v685_v30 = vadd.f32 %v2611_v45, %v2628_v19  ;;  %v2858_v45 = vld [vmem:[#allocation2 + $0x111] sm:$0xff] }
 0x16c   : > { %v794_v40 = vpop.f32.mrf.mxu2 }
 0x16d   : > { %3353 = vst [vmem:[#allocation33_spill] sm:$0xff] %v2833_v1  ;;  %v795_v59 = vadd.f32 %v794_v40, %v682_v23  ;;  %v1020_v20 = vpop.f32.mrf.mxu0  ;;  %v2849_v23 = vld [vmem:[#allocation2 + $0x120] sm:$0xff] }
 0x16e   : > { %v2852_v1 = vld [vmem:[#allocation2 + $0x13a] sm:$0xff] }
 0x16f   : > { %v908_v16 = vadd.f32 %v907_v62, %v795_v59  ;;  %3355 = vst [vmem:[#allocation35_spill] sm:$0xff] %v2852_v1  ;;  %1186 = vmatmul.f32.gmra.mxu1 %v2821_v0 }
 0x170   : > { %1067 = vmatmul.f32.gmra.mxu0 %v2841_v22  ;;  %960 = vmatmul.f32.gmra.mxu3 %v2849_v23 }
 0x171   : > { %v1021_v34 = vadd.f32 %v1020_v20, %v908_v16  ;;  %844 = vmatmul.f32.gmra.mxu2 %v2838_v25  ;;  %v913_v54 = vpop.f32.mrf.mxu3  ;;  %v1672_v16 = vld [vmem:[%s3309_s2 + $0x50] sm:$0xff]  ;;  %v1136_v19 = vpop.f32.mrf.mxu1 }
 0x172   : > { %1683 = vmatpush.msra.mxu1 %v1672_v16  ;;  %v2869_v16 = vld [vmem:[#allocation2 + $0x142] sm:$0xff] }
 0x173   : > { %v2847_v21 = vadd.f32 %v1133_v17, %v1021_v34  ;;  %v1212_v34 = vld [vmem:[#allocation3 + $0x308] sm:$0xff] }
 0x174   : > { %v797_v40 = vpop.f32.mrf.mxu2  ;;  %1273 = vmatpush.msra.mxu2 %v1212_v34  ;;  %v2872_v34 = vld [vmem:[#allocation2 + $0x121] sm:$0xff] }
 0x175   : > { %3354 = vst [vmem:[#allocation34_spill] sm:$0xff] %v2847_v21  ;;  %v798_v59 = vadd.f32 %v797_v40, %v685_v30  ;;  %v1023_v62 = vpop.f32.mrf.mxu0  ;;  %v2866_v40 = vld [vmem:[#allocation2 + $0x128] sm:$0xff] }
 0x177   : > { %v911_v20 = vadd.f32 %v910_v58, %v798_v59  ;;  %v688_v58 = vadd.f32 %v2624_v55, %v2641_v56  ;;  %1189 = vmatmul.f32.gmra.mxu1 %v2838_v25  ;;  %v1244_v56 = vld [vmem:[#allocation3 + $0x408] sm:$0xff] }
 0x178   : > { %1070 = vmatmul.f32.gmra.mxu0 %v2858_v45  ;;  %963 = vmatmul.f32.gmra.mxu3 %v2866_v40 }
 0x179   : > { %v1024_v17 = vadd.f32 %v1023_v62, %v911_v20  ;;  %847 = vmatmul.f32.gmra.mxu2 %v2852_v1  ;;  %v916_v62 = vpop.f32.mrf.mxu3  ;;  %1499 = vmatpush.msra.mxu0 %v1244_v56  ;;  %v2889_v56 = vld [vmem:[#allocation2 + $0x129] sm:$0xff] }
 0x17b   : > { %v2864_v30 = vadd.f32 %v1136_v19, %v1024_v17  ;;  %v691_v19 = vadd.f32 %v2637_v3, %v2654_v53  ;;  %v2880_v17 = vld [vmem:[#allocation2 + $0x138] sm:$0xff]  ;;  %v1211_v53 = vld [vmem:[#allocation3 + $0x300] sm:$0xff] }
 0x17c   : > { %v800_v59 = vpop.f32.mrf.mxu2  ;;  %1274 = vmatpush.msra.mxu2 %v1211_v53 }
 0x17d   : > { %3356 = vst [vmem:[#allocation36_spill] sm:$0xff] %v2864_v30  ;;  %v801_v21 = vadd.f32 %v800_v59, %v688_v58  ;;  %v1026_v0 = vpop.f32.mrf.mxu0 }
 0x17f   : > { %v914_v20 = vadd.f32 %v913_v54, %v801_v21  ;;  %v2883_v21 = vld [vmem:[#allocation2 + $0x152] sm:$0xff]  ;;  %1192 = vmatmul.f32.gmra.mxu1 %v2852_v1  ;;  %v2900_v1 = vld [vmem:[#allocation2 + $0x15a] sm:$0xff] }
 0x180   : > { %1073 = vmatmul.f32.gmra.mxu0 %v2872_v34  ;;  %966 = vmatmul.f32.gmra.mxu3 %v2880_v17  ;;  %3358 = vst [vmem:[#allocation38_spill] sm:$0xff] %v2883_v21 }
 0x181   : > { %v2875_v55 = vadd.f32 %v1026_v0, %v914_v20  ;;  %850 = vmatmul.f32.gmra.mxu2 %v2869_v16  ;;  %v919_v59 = vpop.f32.mrf.mxu3  ;;  %v1671_v20 = vld [vmem:[%s3309_s2 + $0x48] sm:$0xff] }
 0x182   : > { %1684 = vmatpush.msra.mxu1 %v1671_v20  ;;  %v2903_v20 = vld [vmem:[#allocation2 + $0x139] sm:$0xff] }
 0x183   : > { %3357 = vst [vmem:[#allocation37_spill] sm:$0xff] %v2875_v55 }
 0x184   : > { %v803_v38 = vpop.f32.mrf.mxu2 }
 0x185   : > { %v804_v58 = vadd.f32 %v803_v38, %v691_v19  ;;  %v1029_v54 = vpop.f32.mrf.mxu0  ;;  %v1227_v19 = vld [vmem:[#allocation3 + $0x380] sm:$0xff]  ;;  %v2897_v38 = vld [vmem:[#allocation2 + $0x140] sm:$0xff] }
 0x186   : > { %1387 = vmatpush.msra.mxu3 %v1227_v19  ;;  %v2911_v19 = vld [vmem:[#allocation2 + $0x150] sm:$0xff] }
 0x187   : > { %v917_v0 = vadd.f32 %v916_v62, %v804_v58  ;;  %v694_v62 = vadd.f32 %v2650_v14, %v2667_v63  ;;  %1195 = vmatmul.f32.gmra.mxu1 %v2869_v16  ;;  %v1243_v14 = vld [vmem:[#allocation3 + $0x400] sm:$0xff]  ;;  %v697_v63 = vadd.f32 %v2663_v26, %v2680_v8  ;;  %3361 = vst [vmem:[#allocation41_spill] sm:$0xff] %v2911_v19 }
 0x188   : > { %1076 = vmatmul.f32.gmra.mxu0 %v2889_v56  ;;  %969 = vmatmul.f32.gmra.mxu3 %v2897_v38  ;;  %v700_v8 = vadd.f32 %v2676_v41, %v2693_v18 }
 0x189   : > { %v2892_v3 = vadd.f32 %v1029_v54, %v917_v0  ;;  %853 = vmatmul.f32.gmra.mxu2 %v2883_v21  ;;  %v922_v54 = vpop.f32.mrf.mxu3  ;;  %1500 = vmatpush.msra.mxu0 %v1243_v14  ;;  %v2920_v14 = vld [vmem:[#allocation2 + $0x141] sm:$0xff] }
 0x18b   : > { %3359 = vst [vmem:[#allocation39_spill] sm:$0xff] %v2892_v3 }
 0x18c   : > { %v806_v58 = vpop.f32.mrf.mxu2 }
 0x18d   : > { %v807_v55 = vadd.f32 %v806_v58, %v694_v62  ;;  %v1032_v30 = vpop.f32.mrf.mxu0 }
 0x18f   : > { %v920_v0 = vadd.f32 %v919_v59, %v807_v55  ;;  %v2914_v59 = vld [vmem:[#allocation2 + $0x16a] sm:$0xff]  ;;  %1198 = vmatmul.f32.gmra.mxu1 %v2883_v21 }
 0x190   : > { %1079 = vmatmul.f32.gmra.mxu0 %v2903_v20  ;;  %972 = vmatmul.f32.gmra.mxu3 %v2911_v19  ;;  %v2932_v19 = vld [vmem:[#allocation2 + $0x151] sm:$0xff] }
 0x191   : > { %v2906_v53 = vadd.f32 %v1032_v30, %v920_v0  ;;  %856 = vmatmul.f32.gmra.mxu2 %v2900_v1  ;;  %v925_v3 = vpop.f32.mrf.mxu3  ;;  %v1670_v0 = vld [vmem:[%s3309_s2 + $0x40] sm:$0xff] }
 0x192   : > { %1685 = vmatpush.msra.mxu1 %v1670_v0  ;;  %v2941_v0 = vld [vmem:[#allocation2 + $0x182] sm:$0xff] }
 0x193   : > { %3360 = vst [vmem:[#allocation40_spill] sm:$0xff] %v2906_v53 }
 0x194   : > { %v809_v62 = vpop.f32.mrf.mxu2 }
 0x195   : > { %v810_v58 = vadd.f32 %v809_v62, %v697_v63  ;;  %v1035_v55 = vpop.f32.mrf.mxu0 }
 0x197   : > { %v923_v30 = vadd.f32 %v922_v54, %v810_v58  ;;  %v2929_v58 = vld [vmem:[#allocation2 + $0x172] sm:$0xff]  ;;  %1201 = vmatmul.f32.gmra.mxu1 %v2900_v1 }
 0x198   : > { %1082 = vmatmul.f32.gmra.mxu0 %v2920_v14  ;;  %975 = vmatmul.f32.gmra.mxu3 %v2490_v61  ;;  %v703_v61 = vadd.f32 %v2689_v60, %v2706_v27 }
 0x199   : > { %v2923_v26 = vadd.f32 %v1035_v55, %v923_v30  ;;  %859 = vmatmul.f32.gmra.mxu2 %v2914_v59  ;;  %v928_v53 = vpop.f32.mrf.mxu3 }
 0x19c   : > { %v812_v63 = vpop.f32.mrf.mxu2 }
 0x19d   : > { %v813_v54 = vadd.f32 %v812_v63, %v700_v8  ;;  %v1038_v62 = vpop.f32.mrf.mxu0  ;;  %v2947_v63 = vld [vmem:[#allocation2 + $0x159] sm:$0xff] }
 0x19f   : > { %v926_v21 = vadd.f32 %v925_v3, %v813_v54  ;;  %1204 = vmatmul.f32.gmra.mxu1 %v2914_v59 }
 0x1a0   : > { %1085 = vmatmul.f32.gmra.mxu0 %v2932_v19  ;;  %978 = vmatmul.f32.gmra.mxu3 %v2505_v15  ;;  %v706_v15 = vadd.f32 %v2702_v13, %v2722_v43  ;;  %v2047_v43 = vld [vmem:[#allocation2 + $0x31] sm:$0xff] }
 0x1a1   : > { %v2935_v55 = vadd.f32 %v1038_v62, %v926_v21  ;;  %862 = vmatmul.f32.gmra.mxu2 %v2929_v58  ;;  %v931_v8 = vpop.f32.mrf.mxu3  ;;  %v1669_v21 = vld [vmem:[%s3309_s2 + $0x38] sm:$0xff]  ;;  %v2956_v62 = vld [vmem:[#allocation2 + $0x18a] sm:$0xff] }
 0x1a2   : > { %1686 = vmatpush.msra.mxu1 %v1669_v21  ;;  %3362 = vst [vmem:[#allocation42_spill] sm:$0xff] %v2956_v62 }
 0x1a4   : > { %v815_v41 = vpop.f32.mrf.mxu2 }
 0x1a5   : > { %v816_v18 = vadd.f32 %v815_v41, %v703_v61  ;;  %v1041_v30 = vpop.f32.mrf.mxu0 }
 0x1a7   : > { %v929_v3 = vadd.f32 %v928_v53, %v816_v18  ;;  %1207 = vmatmul.f32.gmra.mxu1 %v2929_v58  ;;  %v2959_v18 = vld [vmem:[#allocation2 + $0x169] sm:$0xff] }
 0x1a8   : > { %1088 = vmatmul.f32.gmra.mxu0 %v2947_v63  ;;  %981 = vmatmul.f32.gmra.mxu3 %v2515_v32  ;;  %v709_v32 = vadd.f32 %v2718_v47, %v2733_v31  ;;  %v712_v47 = vadd.f32 %v2539_v46, %v2542_v9  ;;  %v2050_v31 = vld [vmem:[#allocation2 + $0x39] sm:$0xff] }
 0x1a9   : > { %v2950_v60 = vadd.f32 %v1041_v30, %v929_v3  ;;  %865 = vmatmul.f32.gmra.mxu2 %v2941_v0  ;;  %v934_v61 = vpop.f32.mrf.mxu3 }
 0x1ac   : > { %v818_v27 = vpop.f32.mrf.mxu2 }
 0x1ad   : > { %v819_v53 = vadd.f32 %v818_v27, %v706_v15  ;;  %v1044_v54 = vpop.f32.mrf.mxu0 }
 0x1af   : > { %v932_v41 = vadd.f32 %v931_v8, %v819_v53  ;;  %v1668_v8 = vld [vmem:[%s3309_s2 + $0x30] sm:$0xff] }
 0x1b0   : > { %1091 = vmatmul.f32.gmra.mxu0 %v2959_v18  ;;  %1388 = vmatmul.f32.vlgmr.msra.gmra.mxu3 %v2047_v43  ;;  %v2970_v53 = vld [vmem:[#allocation2 + $0x171] sm:$0xff] }
 0x1b1   : > { %v2962_v30 = vadd.f32 %v1044_v54, %v932_v41  ;;  %868 = vmatmul.f32.gmra.mxu2 %v2956_v62  ;;  %v937_v15 = vpop.f32.mrf.mxu3  ;;  %1687 = vmatpush.msra.mxu1 %v1668_v8  ;;  %v2049_v41 = vld [vmem:[#allocation2 + $0x30] sm:$0xff]  ;;  %v2051_v62 = vld [vmem:[#allocation2 + $0x38] sm:$0xff] }
 0x1b3   : > { %3363 = vst [vmem:[#allocation43_spill] sm:$0xff] %v2962_v30 }
 0x1b4   : > { %v821_v13 = vpop.f32.mrf.mxu2 }
 0x1b5   : > { %v822_v3 = vadd.f32 %v821_v13, %v709_v32  ;;  %v1047_v21 = vpop.f32.mrf.mxu0 }
 0x1b7   : > { %v935_v27 = vadd.f32 %v934_v61, %v822_v3 }
 0x1b8   : > { %1094 = vmatmul.f32.gmra.mxu0 %v2970_v53  ;;  %1391 = vmatmul.f32.gmra.mxu3 %v2050_v31 }
 0x1b9   : > { %v2973_v54 = vadd.f32 %v1047_v21, %v935_v27  ;;  %1275 = vmatmul.f32.vlgmr.msra.gmra.mxu2 %v2049_v41  ;;  %v940_v13 = vpop.f32.mrf.mxu3  ;;  %v2052_v21 = vld [vmem:[#allocation2 + $0x49] sm:$0xff] }
 0x1bc   : > { %v824_v32 = vpop.f32.mrf.mxu2 }
 0x1bd   : > { %v825_v61 = vadd.f32 %v824_v32, %v712_v47  ;;  %v1050_v43 = vpop.f32.mrf.mxu0  ;;  %v1667_v47 = vld [vmem:[%s3309_s2 + $0x28] sm:$0xff] }
 0x1be   : > { %1688 = vmatpush.msra.mxu1 %v1667_v47 }
 0x1bf   : > { %v938_v3 = vadd.f32 %v937_v15, %v825_v61  ;;  %v2053_v15 = vld [vmem:[#allocation2 + $0x48] sm:$0xff] }
 0x1c0   : > { %1501 = vmatmul.f32.vlgmr.msra.gmra.mxu0 %v2556_v35  ;;  %1394 = vmatmul.f32.gmra.mxu3 %v2052_v21  ;;  %v2991_v21 = vpop.f32.mrf.mxu1 }
 0x1c1   : > { %v2978_v30 = vadd.f32 %v1050_v43, %v938_v3  ;;  %1278 = vmatmul.f32.gmra.mxu2 %v2051_v62  ;;  %v943_v46 = vpop.f32.mrf.mxu3  ;;  %v2054_v62 = vld [vmem:[#allocation2 + $0x51] sm:$0xff] }
 0x1c2   : > { %v2055_v3 = vld [vmem:[#allocation2 + $0x50] sm:$0xff] }
 0x1c3   : > { %3364 = vst [vmem:[#allocation44_spill] sm:$0xff] %v2978_v30 }
 0x1c4   : > { %v827_v27 = vpop.f32.mrf.mxu2 }
 0x1c5   : > { %v828_v8 = vadd.f32 %v827_v27, %v2552_v28  ;;  %v1053_v41 = vpop.f32.mrf.mxu0 }
 0x1c7   : > { %v941_v9 = vadd.f32 %v940_v13, %v828_v8 }
 0x1c8   : > { %1504 = vmatmul.f32.gmra.mxu0 %v2566_v51  ;;  %1397 = vmatmul.f32.gmra.mxu3 %v2054_v62  ;;  %v2056_v51 = vld [vmem:[#allocation2 + $0x61] sm:$0xff] }
 0x1c9   : > { %v2985_v35 = vadd.f32 %v1053_v41, %v941_v9  ;;  %1281 = vmatmul.f32.gmra.mxu2 %v2053_v15  ;;  %v2058_v15 = vld [vmem:[#allocation2 + $0x69] sm:$0xff] }
 0x1cb   : > { %3365 = vst [vmem:[#allocation45_spill] sm:$0xff] %v2985_v35  ;;  %v946_v61 = vpop.f32.mrf.mxu3 }
 0x1cc   : > { %v830_v31 = vpop.f32.mrf.mxu2 }
 0x1cd   : > { %v831_v32 = vadd.f32 %v830_v31, %v2562_v49  ;;  %v1056_v28 = vpop.f32.mrf.mxu0  ;;  %v1666_v49 = vld [vmem:[%s3309_s2 + $0x20] sm:$0xff] }
 0x1ce   : > { %1689 = vmatpush.msra.mxu1 %v1666_v49 }
 0x1cf   : > { %v944_v43 = vadd.f32 %v943_v46, %v831_v32  ;;  %v2057_v46 = vld [vmem:[#allocation2 + $0x60] sm:$0xff]  ;;  %v3001_v32 = vpop.f32.mrf.mxu1 }
 0x1d0   : > { %1507 = vmatmul.f32.gmra.mxu0 %v2578_v4  ;;  %1400 = vmatmul.f32.gmra.mxu3 %v2056_v51 }
 0x1d1   : > { %v2989_v13 = vadd.f32 %v1056_v28, %v944_v43  ;;  %1284 = vmatmul.f32.gmra.mxu2 %v2055_v3  ;;  %v2060_v3 = vld [vmem:[#allocation2 + $0x79] sm:$0xff] }
 0x1d3   : > { %3366 = vst [vmem:[#allocation46_spill] sm:$0xff] %v2989_v13  ;;  %v949_v9 = vpop.f32.mrf.mxu3 }
 0x1d4   : > { %v833_v27 = vpop.f32.mrf.mxu2 }
 0x1d5   : > { %v834_v8 = vadd.f32 %v833_v27, %v2574_v2  ;;  %v1059_v41 = vpop.f32.mrf.mxu0  ;;  %v3369_v27 = vld [vmem:[#allocation6_spill] sm:$0xff] }
 0x1d7   : > { %v947_v47 = vadd.f32 %v946_v61, %v834_v8 }
 0x1d8   : > { %1510 = vmatmul.f32.gmra.mxu0 %v2591_v24  ;;  %1403 = vmatmul.f32.gmra.mxu3 %v2058_v15  ;;  %v2059_v24 = vld [vmem:[#allocation2 + $0x68] sm:$0xff]  ;;  %v2061_v15 = vld [vmem:[#allocation2 + $0x78] sm:$0xff] }
 0x1d9   : > { %v2998_v4 = vadd.f32 %v1059_v41, %v947_v47  ;;  %1287 = vmatmul.f32.gmra.mxu2 %v2057_v46  ;;  %v3010_v46 = vpop.f32.mrf.mxu1 }
 0x1db   : > { %3367 = vst [vmem:[#allocation47_spill] sm:$0xff] %v2998_v4  ;;  %v952_v28 = vpop.f32.mrf.mxu3 }
 0x1dc   : > { %v836_v62 = vpop.f32.mrf.mxu2 }
 0x1dd   : > { %v837_v31 = vadd.f32 %v836_v62, %v2587_v6  ;;  %v1062_v2 = vpop.f32.mrf.mxu0  ;;  %v1665_v6 = vld [vmem:[%s3309_s2 + $0x18] sm:$0xff]  ;;  %v2062_v62 = vld [vmem:[#allocation2 + $0x81] sm:$0xff] }
 0x1de   : > { %1690 = vmatpush.msra.mxu1 %v1665_v6  ;;  %v3375_v6 = vld [vmem:[#allocation9_spill] sm:$0xff] }
 0x1df   : > { %v950_v61 = vadd.f32 %v949_v9, %v837_v31  ;;  %v3370_v9 = vld [vmem:[#allocation8_spill] sm:$0xff] }
 0x1e0   : > { %1513 = vmatmul.f32.gmra.mxu0 %v2604_v42  ;;  %1406 = vmatmul.f32.gmra.mxu3 %v2060_v3 }
 0x1e1   : > { %v3004_v43 = vadd.f32 %v1062_v2, %v950_v61  ;;  %1290 = vmatmul.f32.gmra.mxu2 %v2059_v24  ;;  %v3372_v2 = vld [vmem:[#allocation7_spill] sm:$0xff] }
 0x1e3   : > { %3368 = vst [vmem:[#allocation48_spill] sm:$0xff] %v3004_v43  ;;  %v955_v47 = vpop.f32.mrf.mxu3 }
 0x1e4   : > { %v839_v51 = vpop.f32.mrf.mxu2 }
 0x1e5   : > { %v840_v8 = vadd.f32 %v839_v51, %v3369_v27  ;;  %v1065_v41 = vpop.f32.mrf.mxu0  ;;  %v3373_v51 = vld [vmem:[#allocation10_spill] sm:$0xff] }
 0x1e7   : > { %v953_v49 = vadd.f32 %v952_v28, %v840_v8  ;;  %v2063_v8 = vld [vmem:[#allocation2 + $0x80] sm:$0xff] }
 0x1e8   : > { %1516 = vmatmul.f32.gmra.mxu0 %v3370_v9  ;;  %1409 = vmatmul.f32.gmra.mxu3 %v2062_v62  ;;  %v3019_v9 = vpop.f32.mrf.mxu1 }
 0x1e9   : > { %v3013_v42 = vadd.f32 %v1065_v41, %v953_v49  ;;  %1293 = vmatmul.f32.gmra.mxu2 %v2061_v15  ;;  %v2064_v41 = vld [vmem:[#allocation2 + $0x91] sm:$0xff] }
 0x1eb   : > { %3371 = vst [vmem:[#allocation6_spill] sm:$0xff] %v3013_v42  ;;  %v958_v28 = vpop.f32.mrf.mxu3 }
 0x1ec   : > { %v842_v31 = vpop.f32.mrf.mxu2 }
 0x1ed   : > { %v843_v61 = vadd.f32 %v842_v31, %v3372_v2  ;;  %v1068_v24 = vpop.f32.mrf.mxu0  ;;  %v3376_v31 = vld [vmem:[#allocation12_spill] sm:$0xff] }
 0x1ef   : > { %v956_v3 = vadd.f32 %v955_v47, %v843_v61  ;;  %v1664_v47 = vld [vmem:[%s3309_s2 + $0x10] sm:$0xff] }
 0x1f0   : > { %1519 = vmatmul.f32.gmra.mxu0 %v3373_v51  ;;  %1412 = vmatmul.f32.gmra.mxu3 %v2064_v41  ;;  %v2065_v61 = vld [vmem:[#allocation2 + $0x90] sm:$0xff] }
 0x1f1   : > { %v3017_v27 = vadd.f32 %v1068_v24, %v956_v3  ;;  %1296 = vmatmul.f32.gmra.mxu2 %v2063_v8  ;;  %1691 = vmatpush.msra.mxu1 %v1664_v47  ;;  %v2066_v24 = vld [vmem:[#allocation2 + $0x99] sm:$0xff]  ;;  %v3028_v3 = vpop.f32.mrf.mxu1  ;;  %v3381_v47 = vld [vmem:[#allocation13_spill] sm:$0xff] }
 0x1f2   : > { %v3378_v8 = vld [vmem:[#allocation11_spill] sm:$0xff] }
 0x1f3   : > { %3374 = vst [vmem:[#allocation8_spill] sm:$0xff] %v3017_v27  ;;  %v961_v42 = vpop.f32.mrf.mxu3 }
 0x1f4   : > { %v845_v49 = vpop.f32.mrf.mxu2 }
 0x1f5   : > { %v846_v15 = vadd.f32 %v845_v49, %v3375_v6  ;;  %v1071_v62 = vpop.f32.mrf.mxu0 }
 0x1f7   : > { %v959_v43 = vadd.f32 %v958_v28, %v846_v15  ;;  %v3379_v15 = vld [vmem:[#allocation14_spill] sm:$0xff] }
 0x1f8   : > { %1522 = vmatmul.f32.gmra.mxu0 %v3376_v31  ;;  %1415 = vmatmul.f32.gmra.mxu3 %v2066_v24  ;;  %v2067_v31 = vld [vmem:[#allocation2 + $0x98] sm:$0xff] }
 0x1f9   : > { %v3026_v2 = vadd.f32 %v1071_v62, %v959_v43  ;;  %1299 = vmatmul.f32.gmra.mxu2 %v2065_v61  ;;  %v2068_v43 = vld [vmem:[#allocation2 + $0xa9] sm:$0xff] }
 0x1fb   : > { %3377 = vst [vmem:[#allocation7_spill] sm:$0xff] %v3026_v2  ;;  %v964_v28 = vpop.f32.mrf.mxu3  ;;  %v3035_v2 = vpop.f32.mrf.mxu1 }
 0x1fc   : > { %v848_v51 = vpop.f32.mrf.mxu2 }
 0x1fd   : > { %v849_v41 = vadd.f32 %v848_v51, %v3378_v8  ;;  %v1074_v49 = vpop.f32.mrf.mxu0  ;;  %v3382_v51 = vld [vmem:[#allocation16_spill] sm:$0xff] }
 0x1ff   : > { %v962_v6 = vadd.f32 %v961_v42, %v849_v41  ;;  %v1663_v42 = vld [vmem:[%s3309_s2 + $0x8] sm:$0xff] }
 0x200   : > { %1525 = vmatmul.f32.gmra.mxu0 %v3379_v15  ;;  %1418 = vmatmul.f32.gmra.mxu3 %v2068_v43  ;;  %v2069_v41 = vld [vmem:[#allocation2 + $0xa8] sm:$0xff]  ;;  %v3384_v15 = vld [vmem:[#allocation15_spill] sm:$0xff] }
 0x201   : > { %v3032_v27 = vadd.f32 %v1074_v49, %v962_v6  ;;  %1302 = vmatmul.f32.gmra.mxu2 %v2067_v31  ;;  %1692 = vmatpush.msra.mxu1 %v1663_v42  ;;  %v2070_v49 = vld [vmem:[#allocation2 + $0xb1] sm:$0xff]  ;;  %v3387_v42 = vld [vmem:[#allocation17_spill] sm:$0xff] }
 0x203   : > { %3380 = vst [vmem:[#allocation10_spill] sm:$0xff] %v3032_v27  ;;  %v967_v4 = vpop.f32.mrf.mxu3 }
 0x204   : > { %v851_v62 = vpop.f32.mrf.mxu2 }
 0x205   : > { %v852_v61 = vadd.f32 %v851_v62, %v3381_v47  ;;  %v1077_v24 = vpop.f32.mrf.mxu0 }
 0x207   : > { %v965_v13 = vadd.f32 %v964_v28, %v852_v61  ;;  %v3044_v28 = vpop.f32.mrf.mxu1  ;;  %v3385_v61 = vld [vmem:[#allocation18_spill] sm:$0xff] }
 0x208   : > { %1528 = vmatmul.f32.gmra.mxu0 %v3382_v51  ;;  %1421 = vmatmul.f32.gmra.mxu3 %v2070_v49  ;;  %v2071_v51 = vld [vmem:[#allocation2 + $0xb0] sm:$0xff] }
 0x209   : > { %v3041_v8 = vadd.f32 %v1077_v24, %v965_v13  ;;  %1305 = vmatmul.f32.gmra.mxu2 %v2069_v41  ;;  %v2072_v13 = vld [vmem:[#allocation2 + $0xc1] sm:$0xff] }
 0x20b   : > { %3383 = vst [vmem:[#allocation9_spill] sm:$0xff] %v3041_v8  ;;  %v970_v62 = vpop.f32.mrf.mxu3 }
 0x20c   : > { %v854_v6 = vpop.f32.mrf.mxu2 }
 0x20d   : > { %v855_v31 = vadd.f32 %v854_v6, %v3384_v15  ;;  %v1080_v43 = vpop.f32.mrf.mxu0  ;;  %v3388_v6 = vld [vmem:[#allocation20_spill] sm:$0xff] }
 0x20f   : > { %v968_v47 = vadd.f32 %v967_v4, %v855_v31  ;;  %v1662_v4 = vld [vmem:[%s3309_s2] sm:$0xff] }
 0x210   : > { %1531 = vmatmul.f32.gmra.mxu0 %v3385_v61  ;;  %1424 = vmatmul.f32.gmra.mxu3 %v2072_v13  ;;  %v2073_v31 = vld [vmem:[#allocation2 + $0xc0] sm:$0xff] }
 0x211   : > { %v3047_v27 = vadd.f32 %v1080_v43, %v968_v47  ;;  %1308 = vmatmul.f32.gmra.mxu2 %v2071_v51  ;;  %1693 = vmatpush.msra.mxu1 %v1662_v4  ;;  %v3056_v43 = vpop.f32.mrf.mxu1  ;;  %v2074_v47 = vld [vmem:[#allocation2 + $0xc9] sm:$0xff]  ;;  %v3390_v51 = vld [vmem:[#allocation19_spill] sm:$0xff] }
 0x212   : > { %v3392_v4 = vld [vmem:[#allocation21_spill] sm:$0xff] }
 0x213   : > { %3386 = vst [vmem:[#allocation12_spill] sm:$0xff] %v3047_v27  ;;  %v973_v8 = vpop.f32.mrf.mxu3 }
 0x214   : > { %v857_v24 = vpop.f32.mrf.mxu2 }
 0x215   : > { %v858_v41 = vadd.f32 %v857_v24, %v3387_v42  ;;  %v1083_v49 = vpop.f32.mrf.mxu0 }
 0x217   : > { %v971_v35 = vadd.f32 %v970_v62, %v858_v41  ;;  %v3391_v41 = vld [vmem:[#allocation22_spill] sm:$0xff] }
 0x218   : > { %1534 = vmatmul.f32.gmra.mxu0 %v3388_v6  ;;  %1427 = vmatmul.f32.gmra.mxu3 %v2074_v47  ;;  %v2075_v6 = vld [vmem:[#allocation2 + $0xc8] sm:$0xff] }
 0x219   : > { %v3054_v15 = vadd.f32 %v1083_v49, %v971_v35  ;;  %1311 = vmatmul.f32.gmra.mxu2 %v2073_v31  ;;  %v3063_v35 = vpop.f32.mrf.mxu1 }
 0x21b   : > { %3389 = vst [vmem:[#allocation11_spill] sm:$0xff] %v3054_v15  ;;  %v976_v62 = vpop.f32.mrf.mxu3 }
 0x21c   : > { %v860_v61 = vpop.f32.mrf.mxu2 }
 0x21d   : > { %v861_v13 = vadd.f32 %v860_v61, %v3390_v51  ;;  %v1086_v24 = vpop.f32.mrf.mxu0  ;;  %v3393_v51 = vld [vmem:[#allocation23_spill] sm:$0xff] }
 0x21f   : > { %v974_v42 = vadd.f32 %v973_v8, %v861_v13 }
 0x220   : > { %1537 = vmatmul.f32.gmra.mxu0 %v3391_v41  ;;  %1430 = vmatmul.f32.gmra.mxu3 %v2779_v10 }
 0x221   : > { %v3060_v27 = vadd.f32 %v1086_v24, %v974_v42  ;;  %1314 = vmatmul.f32.gmra.mxu2 %v2075_v6  ;;  %v3072_v24 = vpop.f32.mrf.mxu1 }
 0x223   : > { %v979_v15 = vpop.f32.mrf.mxu3 }
 0x224   : > { %v863_v49 = vpop.f32.mrf.mxu2 }
 0x225   : > { %v864_v31 = vadd.f32 %v863_v49, %v3392_v4  ;;  %v1089_v47 = vpop.f32.mrf.mxu0 }
 0x227   : > { %v977_v30 = vadd.f32 %v976_v62, %v864_v31 }
 0x228   : > { %1540 = vmatmul.f32.gmra.mxu0 %v2724_v11  ;;  %1433 = vmatmul.f32.gmra.mxu3 %v2796_v7 }
 0x229   : > { %v3067_v61 = vadd.f32 %v1089_v47, %v977_v30  ;;  %1317 = vmatmul.f32.gmra.mxu2 %v2757_v12  ;;  %v3394_v12 = vld [vmem:[#allocation24_spill] sm:$0xff]  ;;  %v3080_v4 = vpop.f32.mrf.mxu1 }
 0x22b   : > { %v982_v42 = vpop.f32.mrf.mxu3 }
 0x22c   : > { %v866_v8 = vpop.f32.mrf.mxu2 }
 0x22d   : > { %v867_v13 = vadd.f32 %v866_v8, %v3393_v51  ;;  %v1092_v10 = vpop.f32.mrf.mxu0  ;;  %v3395_v8 = vld [vmem:[#allocation25_spill] sm:$0xff] }
 0x22f   : > { %v980_v41 = vadd.f32 %v979_v15, %v867_v13 }
 0x230   : > { %1543 = vmatmul.f32.gmra.mxu0 %v2735_v57  ;;  %1436 = vmatmul.f32.gmra.mxu3 %v2810_v52 }
 0x231   : > { %v3075_v6 = vadd.f32 %v1092_v10, %v980_v41  ;;  %1320 = vmatmul.f32.gmra.mxu2 %v2773_v37  ;;  %v3090_v13 = vpop.f32.mrf.mxu1 }
 0x233   : > { %v1389_v62 = vpop.f32.mrf.mxu3 }
 0x234   : > { %v869_v11 = vpop.f32.mrf.mxu2 }
 0x235   : > { %v870_v30 = vadd.f32 %v869_v11, %v3394_v12  ;;  %v1095_v7 = vpop.f32.mrf.mxu0  ;;  %v3396_v11 = vld [vmem:[#allocation26_spill] sm:$0xff] }
 0x237   : > { %v983_v49 = vadd.f32 %v982_v42, %v870_v30 }
 0x238   : > { %1546 = vmatmul.f32.gmra.mxu0 %v2747_v33  ;;  %1439 = vmatmul.f32.gmra.mxu3 %v2827_v39 }
 0x239   : > { %v3083_v31 = vadd.f32 %v1095_v7, %v983_v49  ;;  %1323 = vmatmul.f32.gmra.mxu2 %v2787_v29 }
 0x23b   : > { %v1392_v52 = vpop.f32.mrf.mxu3 }
 0x23c   : > { %v1276_v57 = vpop.f32.mrf.mxu2 }
 0x23d   : > { %v1390_v37 = vadd.f32 %v1389_v62, %v1276_v57  ;;  %v1502_v15 = vpop.f32.mrf.mxu0  ;;  %v3397_v57 = vld [vmem:[#allocation28_spill] sm:$0xff] }
 0x23f   : > { %v1503_v47 = vadd.f32 %v1502_v15, %v1390_v37  ;;  %v3398_v37 = vld [vmem:[#allocation27_spill] sm:$0xff] }
 0x240   : > { %1549 = vmatmul.f32.gmra.mxu0 %v2760_v50  ;;  %1442 = vmatmul.f32.gmra.mxu3 %v2841_v22 }
 0x241   : > { %v1598_v51 = vadd.f32 %v1503_v47, %v3395_v8  ;;  %1326 = vmatmul.f32.gmra.mxu2 %v2804_v44  ;;  %v3097_v44 = vpop.f32.mrf.mxu1 }
 0x243   : > { %v1630_v33 = vmax.f32 %v1598_v51, 0.0  ;;  %v1395_v42 = vpop.f32.mrf.mxu3 }
 0x244   : > { %v1279_v10 = vpop.f32.mrf.mxu2 }
 0x245   : > { %v1393_v29 = vadd.f32 %v1392_v52, %v1279_v10  ;;  %1694 = vmatmul.f32.vlgmr.msra.gmra.mxu1 %v1630_v33  ;;  %v1505_v39 = vpop.f32.mrf.mxu0  ;;  %v3399_v33 = vld [vmem:[#allocation30_spill] sm:$0xff]  ;;  %v3400_v10 = vld [vmem:[#allocation29_spill] sm:$0xff] }
 0x247   : > { %v1506_v41 = vadd.f32 %v1505_v39, %v1393_v29 }
 0x248   : > { %1552 = vmatmul.f32.gmra.mxu0 %v2776_v5  ;;  %1445 = vmatmul.f32.gmra.mxu3 %v2858_v45 }
 0x249   : > { %v1599_v12 = vadd.f32 %v1506_v41, %v3396_v11  ;;  %1329 = vmatmul.f32.gmra.mxu2 %v2818_v48  ;;  %v3103_v47 = vpop.f32.mrf.mxu1 }
 0x24b   : > { %v1631_v50 = vmax.f32 %v1599_v12, 0.0  ;;  %v1398_v62 = vpop.f32.mrf.mxu3 }
 0x24c   : > { %v1282_v30 = vpop.f32.mrf.mxu2 }
 0x24d   : > { %v1396_v7 = vadd.f32 %v1395_v42, %v1282_v30  ;;  %1697 = vmatmul.f32.gmra.mxu1 %v1631_v50  ;;  %v1508_v22 = vpop.f32.mrf.mxu0  ;;  %v3401_v50 = vld [vmem:[#allocation32_spill] sm:$0xff]  ;;  %v3402_v30 = vld [vmem:[#allocation31_spill] sm:$0xff] }
 0x24f   : > { %v1509_v49 = vadd.f32 %v1508_v22, %v1396_v7 }
 0x250   : > { %1555 = vmatmul.f32.gmra.mxu0 %v3397_v57  ;;  %1448 = vmatmul.f32.gmra.mxu3 %v2872_v34 }
 0x251   : > { %v1600_v15 = vadd.f32 %v1509_v49, %v3398_v37  ;;  %1332 = vmatmul.f32.gmra.mxu2 %v2835_v36  ;;  %v3109_v12 = vpop.f32.mrf.mxu1  ;;  %v3403_v37 = vld [vmem:[#allocation33_spill] sm:$0xff] }
 0x253   : > { %v1632_v5 = vmax.f32 %v1600_v15, 0.0  ;;  %v1401_v8 = vpop.f32.mrf.mxu3 }
 0x254   : > { %v1285_v48 = vpop.f32.mrf.mxu2 }
 0x255   : > { %v1399_v52 = vadd.f32 %v1398_v62, %v1285_v48  ;;  %1700 = vmatmul.f32.gmra.mxu1 %v1632_v5  ;;  %v1511_v45 = vpop.f32.mrf.mxu0 }
 0x257   : > { %v1512_v51 = vadd.f32 %v1511_v45, %v1399_v52 }
 0x258   : > { %1558 = vmatmul.f32.gmra.mxu0 %v3399_v33  ;;  %1451 = vmatmul.f32.gmra.mxu3 %v2889_v56  ;;  %v3405_v33 = vld [vmem:[#allocation34_spill] sm:$0xff] }
 0x259   : > { %v1601_v29 = vadd.f32 %v1512_v51, %v3400_v10  ;;  %1335 = vmatmul.f32.gmra.mxu2 %v2849_v23  ;;  %v3118_v5 = vpop.f32.mrf.mxu1  ;;  %v3404_v51 = vld [vmem:[#allocation35_spill] sm:$0xff] }
 0x25b   : > { %v1633_v39 = vmax.f32 %v1601_v29, 0.0  ;;  %v1404_v41 = vpop.f32.mrf.mxu3 }
 0x25c   : > { %v1288_v36 = vpop.f32.mrf.mxu2 }
 0x25d   : > { %v1402_v42 = vadd.f32 %v1401_v8, %v1288_v36  ;;  %1703 = vmatmul.f32.gmra.mxu1 %v1633_v39  ;;  %v1514_v34 = vpop.f32.mrf.mxu0 }
 0x25f   : > { %v1515_v11 = vadd.f32 %v1514_v34, %v1402_v42  ;;  %v3406_v34 = vld [vmem:[#allocation36_spill] sm:$0xff] }
 0x260   : > { %1561 = vmatmul.f32.gmra.mxu0 %v3401_v50  ;;  %1454 = vmatmul.f32.gmra.mxu3 %v2903_v20 }
 0x261   : > { %v1602_v7 = vadd.f32 %v1515_v11, %v3402_v30  ;;  %1338 = vmatmul.f32.gmra.mxu2 %v2866_v40  ;;  %v3407_v11 = vld [vmem:[#allocation41_spill] sm:$0xff] }
 0x263   : > { %v1634_v22 = vmax.f32 %v1602_v7, 0.0  ;;  %v1407_v49 = vpop.f32.mrf.mxu3 }
 0x264   : > { %v1291_v23 = vpop.f32.mrf.mxu2 }
 0x265   : > { %v1405_v62 = vadd.f32 %v1404_v41, %v1291_v23  ;;  %1706 = vmatmul.f32.gmra.mxu1 %v1634_v22  ;;  %v1517_v56 = vpop.f32.mrf.mxu0  ;;  %v3408_v23 = vld [vmem:[#allocation37_spill] sm:$0xff] }
 0x267   : > { %v1518_v57 = vadd.f32 %v1517_v56, %v1405_v62  ;;  %v1140_v62 = vadd.f32 %v2991_v21, %v3408_v23  ;;  %v2081_v23 = vld [vmem:[#allocation2 + $0x189] sm:$0xff] }
 0x268   : > { %1564 = vmatmul.f32.gmra.mxu0 %v2838_v25  ;;  %1457 = vmatmul.f32.gmra.mxu3 %v2920_v14 }
 0x269   : > { %v1603_v15 = vadd.f32 %v1518_v57, %v3403_v37  ;;  %1341 = vmatmul.f32.gmra.mxu2 %v2880_v17  ;;  %v3125_v17 = vpop.f32.mrf.mxu1  ;;  %v2076_v57 = vld [vmem:[#allocation2 + $0x158] sm:$0xff] }
 0x26b   : > { %v1635_v48 = vmax.f32 %v1603_v15, 0.0  ;;  %v1410_v45 = vpop.f32.mrf.mxu3 }
 0x26c   : > { %v1294_v40 = vpop.f32.mrf.mxu2 }
 0x26d   : > { %v1408_v52 = vadd.f32 %v1407_v49, %v1294_v40  ;;  %1709 = vmatmul.f32.gmra.mxu1 %v1635_v48  ;;  %v1520_v20 = vpop.f32.mrf.mxu0  ;;  %v3409_v49 = vld [vmem:[#allocation38_spill] sm:$0xff] }
 0x26f   : > { %v1521_v8 = vadd.f32 %v1520_v20, %v1408_v52  ;;  %v3410_v52 = vld [vmem:[#allocation39_spill] sm:$0xff] }
 0x270   : > { %1567 = vmatmul.f32.gmra.mxu0 %v3404_v51  ;;  %1460 = vmatmul.f32.gmra.mxu3 %v2932_v19  ;;  %v1143_v20 = vadd.f32 %v3001_v32, %v3410_v52  ;;  %v2077_v51 = vld [vmem:[#allocation2 + $0x168] sm:$0xff] }
 0x271   : > { %v1604_v10 = vadd.f32 %v1521_v8, %v3405_v33  ;;  %1344 = vmatmul.f32.gmra.mxu2 %v2897_v38  ;;  %v3131_v7 = vpop.f32.mrf.mxu1 }
 0x273   : > { %v1636_v25 = vmax.f32 %v1604_v10, 0.0  ;;  %v1413_v36 = vpop.f32.mrf.mxu3 }
 0x274   : > { %v1297_v29 = vpop.f32.mrf.mxu2 }
 0x275   : > { %v1411_v39 = vadd.f32 %v1410_v45, %v1297_v29  ;;  %1712 = vmatmul.f32.gmra.mxu1 %v1636_v25  ;;  %v1523_v14 = vpop.f32.mrf.mxu0 }
 0x277   : > { %v1524_v42 = vadd.f32 %v1523_v14, %v1411_v39  ;;  %v3411_v39 = vld [vmem:[#allocation40_spill] sm:$0xff] }
 0x278   : > { %1570 = vmatmul.f32.gmra.mxu0 %v2869_v16  ;;  %1463 = vmatmul.f32.gmra.mxu3 %v2947_v63  ;;  %v1146_v14 = vadd.f32 %v3010_v46, %v3411_v39  ;;  %v435_v39 = vld [vmem:[#allocation2 + $0x19a] sm:$0xff] }
 0x279   : > { %v1605_v41 = vadd.f32 %v1524_v42, %v3406_v34  ;;  %1347 = vmatmul.f32.gmra.mxu2 %v3407_v11  ;;  %v3139_v8 = vpop.f32.mrf.mxu1  ;;  %v2078_v42 = vld [vmem:[#allocation2 + $0x170] sm:$0xff] }
 0x27b   : > { %v1637_v50 = vmax.f32 %v1605_v41, 0.0  ;;  %v1416_v22 = vpop.f32.mrf.mxu3  ;;  %v2079_v41 = vld [vmem:[#allocation2 + $0x181] sm:$0xff] }
 0x27c   : > { %v1300_v38 = vpop.f32.mrf.mxu2 }
 0x27d   : > { %v1414_v30 = vadd.f32 %v1413_v36, %v1300_v38  ;;  %1715 = vmatmul.f32.gmra.mxu1 %v1637_v50  ;;  %v1526_v19 = vpop.f32.mrf.mxu0 }
 0x27f   : > { %v1527_v56 = vadd.f32 %v1526_v19, %v1414_v30  ;;  %v1149_v30 = vadd.f32 %v3019_v9, %v2923_v26  ;;  %v2080_v19 = vld [vmem:[#allocation2 + $0x180] sm:$0xff] }
 0x280   : > { %1573 = vmatmul.f32.gmra.mxu0 %v3409_v49  ;;  %1466 = vmatmul.f32.gmra.mxu3 %v2959_v18 }
 0x281   : > { %v1606_v16 = vadd.f32 %v1527_v56, %v1140_v62  ;;  %1350 = vmatmul.f32.gmra.mxu2 %v2076_v57 }
 0x283   : > { %v1638_v37 = vmax.f32 %v1606_v16, 0.0  ;;  %v1419_v40 = vpop.f32.mrf.mxu3 }
 0x284   : > { %v1303_v63 = vpop.f32.mrf.mxu2 }
 0x285   : > { %v1417_v15 = vadd.f32 %v1416_v22, %v1303_v63  ;;  %1718 = vmatmul.f32.gmra.mxu1 %v1638_v37  ;;  %v1529_v48 = vpop.f32.mrf.mxu0  ;;  %v1152_v37 = vadd.f32 %v3028_v3, %v2935_v55  ;;  %v2082_v63 = vld [vmem:[#allocation2 + $0x188] sm:$0xff]  ;;  %v1155_v55 = vadd.f32 %v3035_v2, %v2950_v60 }
 0x286   : > { %v2083_v2 = vld [vmem:[#allocation2 + $0x8] sm:$0xff] }
 0x287   : > { %v1530_v45 = vadd.f32 %v1529_v48, %v1417_v15 }
 0x288   : > { %1576 = vmatmul.f32.gmra.mxu0 %v2900_v1  ;;  %1469 = vmatmul.f32.gmra.mxu3 %v2970_v53  ;;  %v3146_v1 = vpop.f32.mrf.mxu1 }
 0x289   : > { %v1607_v21 = vadd.f32 %v1530_v45, %v1143_v20  ;;  %1353 = vmatmul.f32.gmra.mxu2 %v2077_v51  ;;  %v363_v45 = vld [vmem:[#allocation2 + $0x198] sm:$0xff]  ;;  %v3412_v51 = vld [vmem:[#allocation42_spill] sm:$0xff] }
 0x28b   : > { %v1639_v33 = vmax.f32 %v1607_v21, 0.0  ;;  %v1422_v29 = vpop.f32.mrf.mxu3 }
 0x28c   : > { %v1306_v18 = vpop.f32.mrf.mxu2 }
 0x28d   : > { %v1420_v10 = vadd.f32 %v1419_v40, %v1306_v18  ;;  %1721 = vmatmul.f32.gmra.mxu1 %v1639_v33  ;;  %v1532_v25 = vpop.f32.mrf.mxu0 }
 0x28f   : > { %v1533_v32 = vadd.f32 %v1532_v25, %v1420_v10 }
 0x290   : > { %1579 = vmatmul.f32.gmra.mxu0 %v2914_v59  ;;  %1472 = vmatmul.f32.gmra.mxu3 %v2079_v41  ;;  %v3151_v62 = vpop.f32.mrf.mxu1 }
 0x291   : > { %v1608_v36 = vadd.f32 %v1533_v32, %v1146_v14  ;;  %1356 = vmatmul.f32.gmra.mxu2 %v2078_v42  ;;  %v3413_v32 = vld [vmem:[#allocation43_spill] sm:$0xff] }
 0x293   : > { %v1640_v34 = vmax.f32 %v1608_v36, 0.0  ;;  %v1425_v38 = vpop.f32.mrf.mxu3  ;;  %v1158_v36 = vadd.f32 %v3044_v28, %v3413_v32 }
 0x294   : > { %v1309_v53 = vpop.f32.mrf.mxu2 }
 0x295   : > { %v1423_v11 = vadd.f32 %v1422_v29, %v1309_v53  ;;  %1724 = vmatmul.f32.gmra.mxu1 %v1640_v34  ;;  %v1535_v50 = vpop.f32.mrf.mxu0 }
 0x297   : > { %v1536_v46 = vadd.f32 %v1535_v50, %v1423_v11 }
 0x298   : > { %1582 = vmatmul.f32.gmra.mxu0 %v2929_v58  ;;  %1475 = vmatmul.f32.gmra.mxu3 %v2081_v23  ;;  %v399_v58 = vld [vmem:[#allocation2 + $0x199] sm:$0xff]  ;;  %v3156_v20 = vpop.f32.mrf.mxu1 }
 0x299   : > { %v1609_v59 = vadd.f32 %v1536_v46, %v1149_v30  ;;  %1359 = vmatmul.f32.gmra.mxu2 %v2080_v19  ;;  %v1161_v46 = vadd.f32 %v3056_v43, %v2973_v54 }
 0x29b   : > { %v1641_v22 = vmax.f32 %v1609_v59, 0.0  ;;  %v1428_v57 = vpop.f32.mrf.mxu3 }
 0x29c   : > { %v1312_v56 = vpop.f32.mrf.mxu2 }
 0x29d   : > { %v1426_v49 = vadd.f32 %v1425_v38, %v1312_v56  ;;  %1727 = vmatmul.f32.gmra.mxu1 %v1641_v22  ;;  %v1538_v16 = vpop.f32.mrf.mxu0  ;;  %v436_v38 = vld [vmem:[#allocation2 + $0x1a2] sm:$0xff] }
 0x29f   : > { %v1539_v26 = vadd.f32 %v1538_v16, %v1426_v49 }
 0x2a0   : > { %1585 = vmatmul.f32.gmra.mxu0 %v2941_v0  ;;  %1478 = vmatmul.f32.gmra.mxu3 %v399_v58  ;;  %v400_v0 = vld [vmem:[#allocation2 + $0x1a1] sm:$0xff]  ;;  %v3163_v34 = vpop.f32.mrf.mxu1 }
 0x2a1   : > { %v1610_v9 = vadd.f32 %v1539_v26, %v1152_v37  ;;  %1362 = vmatmul.f32.gmra.mxu2 %v2082_v63  ;;  %v1791_v58 = vld [vmem:[%s2230_s24] sm:$0xff] }
 0x2a3   : > { %v1642_v15 = vmax.f32 %v1610_v9, 0.0  ;;  %v1431_v21 = vpop.f32.mrf.mxu3 }
 0x2a4   : > { %v1315_v48 = vpop.f32.mrf.mxu2 }
 0x2a5   : > { %v1429_v40 = vadd.f32 %v1428_v57, %v1315_v48  ;;  %1730 = vmatmul.f32.gmra.mxu1 %v1642_v15  ;;  %v1541_v52 = vpop.f32.mrf.mxu0  ;;  %v3414_v57 = vld [vmem:[#allocation44_spill] sm:$0xff] }
 0x2a6   : > { %v1164_v37 = vadd.f32 %v3063_v35, %v3414_v57 }
 0x2a7   : > { %v1542_v3 = vadd.f32 %v1541_v52, %v1429_v40  ;;  %v3415_v52 = vld [vmem:[#allocation45_spill] sm:$0xff] }
 0x2a8   : > { %1588 = vmatmul.f32.gmra.mxu0 %v3412_v51  ;;  %1481 = vmatmul.f32.gmra.mxu3 %v400_v0  ;;  %v3167_v19 = vpop.f32.mrf.mxu1 }
 0x2a9   : > { %v1611_v33 = vadd.f32 %v1542_v3, %v1155_v55  ;;  %1365 = vmatmul.f32.gmra.mxu2 %v363_v45  ;;  %v1167_v45 = vadd.f32 %v3072_v24, %v3415_v52  ;;  %v1792_v55 = vld [vmem:[%s2230_s24 + $0x8] sm:$0xff]  ;;  %v1793_v24 = vld [vmem:[%s2230_s24 + $0x10] sm:$0xff] }
 0x2aa   : > { %v3419_v52 = vld [vmem:[#allocation6_spill] sm:$0xff] }
 0x2ab   : > { %v1643_v18 = vmax.f32 %v1611_v33, 0.0  ;;  %v1434_v14 = vpop.f32.mrf.mxu3 }
 0x2ac   : > { %v1318_v10 = vpop.f32.mrf.mxu2 }
 0x2ad   : > { %v1432_v25 = vadd.f32 %v1431_v21, %v1318_v10  ;;  %1733 = vmatmul.f32.gmra.mxu1 %v1643_v18  ;;  %v1544_v29 = vpop.f32.mrf.mxu0 }
 0x2af   : > { %v1545_v42 = vadd.f32 %v1544_v29, %v1432_v25 }
 0x2b0   : > { %1591 = vmatmul.f32.gmra.mxu0 %v435_v39  ;;  %v3416_v39 = vld [vmem:[#allocation46_spill] sm:$0xff] }
 0x2b1   : > { %v1612_v60 = vadd.f32 %v1545_v42, %v1158_v36  ;;  %1368 = vmatmul.f32.gmra.mxu2 %v2083_v2 }
 0x2b3   : > { %v1644_v41 = vmax.f32 %v1612_v60, 0.0  ;;  %v1437_v30 = vpop.f32.mrf.mxu3 }
 0x2b4   : > { %v1321_v53 = vpop.f32.mrf.mxu2 }
 0x2b5   : > { %v1435_v11 = vadd.f32 %v1434_v14, %v1321_v53  ;;  %1736 = vmatmul.f32.gmra.mxu1 %v1644_v41  ;;  %v1547_v50 = vpop.f32.mrf.mxu0  ;;  %v1170_v14 = vadd.f32 %v3080_v4, %v3416_v39  ;;  %v1794_v4 = vld [vmem:[%s2230_s24 + $0x18] sm:$0xff] }
 0x2b7   : > { %v1548_v28 = vadd.f32 %v1547_v50, %v1435_v11 }
 0x2b8   : > { %1594 = vmatmul.f32.gmra.mxu0 %v436_v38  ;;  %v3417_v38 = vld [vmem:[#allocation47_spill] sm:$0xff] }
 0x2b9   : > { %v1613_v59 = vadd.f32 %v1548_v28, %v1161_v46 }
 0x2bb   : > { %v1645_v22 = vmax.f32 %v1613_v59, 0.0  ;;  %v1440_v16 = vpop.f32.mrf.mxu3 }
 0x2bc   : > { %v1324_v23 = vpop.f32.mrf.mxu2 }
 0x2bd   : > { %v1438_v56 = vadd.f32 %v1437_v30, %v1324_v23  ;;  %1739 = vmatmul.f32.gmra.mxu1 %v1645_v22  ;;  %v1550_v49 = vpop.f32.mrf.mxu0  ;;  %v1173_v30 = vadd.f32 %v3090_v13, %v3417_v38  ;;  %v1795_v13 = vld [vmem:[%s2230_s24 + $0x20] sm:$0xff] }
 0x2bf   : > { %v1551_v26 = vadd.f32 %v1550_v49, %v1438_v56 }
 0x2c1   : > { %v1614_v9 = vadd.f32 %v1551_v26, %v1164_v37  ;;  %v3418_v37 = vld [vmem:[#allocation48_spill] sm:$0xff] }
 0x2c2   : > { %v1695_v54 = vpop.f32.mrf.mxu1  ;;  %v1176_v26 = vadd.f32 %v3097_v44, %v3418_v37  ;;  %v1796_v44 = vld [vmem:[%s2230_s24 + $0x28] sm:$0xff] }
 0x2c3   : > { %v1646_v43 = vmax.f32 %v1614_v9, 0.0  ;;  %v1823_v63 = vadd.f32 %v1791_v58, %v1695_v54  ;;  %v1443_v40 = vpop.f32.mrf.mxu3 }
 0x2c4   : > { %v1327_v15 = vpop.f32.mrf.mxu2 }
 0x2c5   : > { %1855 = vst.msk [vmem:[%s3177_s9] sm:$0xff] %vm263_vm0, %v1823_v63  ;;  %v1441_v48 = vadd.f32 %v1440_v16, %v1327_v15  ;;  %1742 = vmatmul.f32.gmra.mxu1 %v1646_v43  ;;  %v1553_v35 = vpop.f32.mrf.mxu0 }
 0x2c7   : > { %v1554_v21 = vadd.f32 %v1553_v35, %v1441_v48 }
 0x2c9   : > { %v1615_v3 = vadd.f32 %v1554_v21, %v1167_v45  ;;  %v1179_v45 = vadd.f32 %v3103_v47, %v3419_v52  ;;  %v1797_v47 = vld [vmem:[%s2230_s24 + $0x30] sm:$0xff] }
 0x2ca   : > { %v1698_v51 = vpop.f32.mrf.mxu1 }
 0x2cb   : > { %v1647_v0 = vmax.f32 %v1615_v3, 0.0  ;;  %v1824_v33 = vadd.f32 %v1792_v55, %v1698_v51  ;;  %v1446_v29 = vpop.f32.mrf.mxu3 }
 0x2cc   : > { %v1330_v18 = vpop.f32.mrf.mxu2 }
 0x2cd   : > { %1856 = vst.msk [vmem:[%s3177_s9 + $0x8] sm:$0xff] %vm263_vm0, %v1824_v33  ;;  %v1444_v10 = vadd.f32 %v1443_v40, %v1330_v18  ;;  %1745 = vmatmul.f32.gmra.mxu1 %v1647_v0  ;;  %v1556_v25 = vpop.f32.mrf.mxu0 }
 0x2cf   : > { %v1557_v32 = vadd.f32 %v1556_v25, %v1444_v10 }
 0x2d1   : > { %v1616_v36 = vadd.f32 %v1557_v32, %v1170_v14 }
 0x2d2   : > { %v1701_v42 = vpop.f32.mrf.mxu1 }
 0x2d3   : > { %v1648_v60 = vmax.f32 %v1616_v36, 0.0  ;;  %v1825_v2 = vadd.f32 %v1793_v24, %v1701_v42  ;;  %v1449_v50 = vpop.f32.mrf.mxu3 }
 0x2d4   : > { %v1333_v41 = vpop.f32.mrf.mxu2 }
 0x2d5   : > { %1857 = vst.msk [vmem:[%s3177_s9 + $0x10] sm:$0xff] %vm263_vm0, %v1825_v2  ;;  %v1447_v53 = vadd.f32 %v1446_v29, %v1333_v41  ;;  %1748 = vmatmul.f32.gmra.mxu1 %v1648_v60  ;;  %v1559_v11 = vpop.f32.mrf.mxu0  ;;  %v3420_v29 = vld [vmem:[#allocation8_spill] sm:$0xff] }
 0x2d6   : > { %v1182_v39 = vadd.f32 %v3109_v12, %v3420_v29  ;;  %v1798_v12 = vld [vmem:[%s2230_s24 + $0x38] sm:$0xff] }
 0x2d7   : > { %v1560_v46 = vadd.f32 %v1559_v11, %v1447_v53  ;;  %v3421_v11 = vld [vmem:[#allocation7_spill] sm:$0xff] }
 0x2d9   : > { %v1617_v28 = vadd.f32 %v1560_v46, %v1173_v30 }
 0x2da   : > { %v1704_v59 = vpop.f32.mrf.mxu1 }
 0x2db   : > { %v1649_v22 = vmax.f32 %v1617_v28, 0.0  ;;  %v1826_v23 = vadd.f32 %v1794_v4, %v1704_v59  ;;  %v1452_v57 = vpop.f32.mrf.mxu3 }
 0x2dc   : > { %v1336_v56 = vpop.f32.mrf.mxu2 }
 0x2dd   : > { %1858 = vst.msk [vmem:[%s3177_s9 + $0x18] sm:$0xff] %vm263_vm0, %v1826_v23  ;;  %v1450_v49 = vadd.f32 %v1449_v50, %v1336_v56  ;;  %1751 = vmatmul.f32.gmra.mxu1 %v1649_v22  ;;  %v1562_v16 = vpop.f32.mrf.mxu0  ;;  %v1185_v50 = vadd.f32 %v3118_v5, %v3421_v11  ;;  %v1799_v5 = vld [vmem:[%s2230_s24 + $0x40] sm:$0xff] }
 0x2df   : > { %v1563_v58 = vadd.f32 %v1562_v16, %v1450_v49  ;;  %v3422_v49 = vld [vmem:[#allocation10_spill] sm:$0xff] }
 0x2e0   : > { %v1188_v16 = vadd.f32 %v3125_v17, %v3422_v49  ;;  %v1800_v17 = vld [vmem:[%s2230_s24 + $0x48] sm:$0xff] }
 0x2e1   : > { %v1618_v9 = vadd.f32 %v1563_v58, %v1176_v26 }
 0x2e2   : > { %v1707_v54 = vpop.f32.mrf.mxu1 }
 0x2e3   : > { %v1650_v43 = vmax.f32 %v1618_v9, 0.0  ;;  %v1827_v63 = vadd.f32 %v1795_v13, %v1707_v54  ;;  %v1455_v40 = vpop.f32.mrf.mxu3 }
 0x2e4   : > { %v1339_v15 = vpop.f32.mrf.mxu2 }
 0x2e5   : > { %1859 = vst.msk [vmem:[%s3177_s9 + $0x20] sm:$0xff] %vm263_vm0, %v1827_v63  ;;  %v1453_v48 = vadd.f32 %v1452_v57, %v1339_v15  ;;  %1754 = vmatmul.f32.gmra.mxu1 %v1650_v43  ;;  %v1565_v35 = vpop.f32.mrf.mxu0  ;;  %v3423_v15 = vld [vmem:[#allocation9_spill] sm:$0xff] }
 0x2e7   : > { %v1566_v21 = vadd.f32 %v1565_v35, %v1453_v48  ;;  %v1191_v48 = vadd.f32 %v3131_v7, %v3423_v15  ;;  %v1801_v7 = vld [vmem:[%s2230_s24 + $0x50] sm:$0xff] }
 0x2e9   : > { %v1619_v55 = vadd.f32 %v1566_v21, %v1179_v45 }
 0x2ea   : > { %v1710_v3 = vpop.f32.mrf.mxu1 }
 0x2eb   : > { %v1651_v51 = vmax.f32 %v1619_v55, 0.0  ;;  %v1828_v0 = vadd.f32 %v1796_v44, %v1710_v3  ;;  %v1458_v25 = vpop.f32.mrf.mxu3 }
 0x2ec   : > { %v1342_v33 = vpop.f32.mrf.mxu2 }
 0x2ed   : > { %1860 = vst.msk [vmem:[%s3177_s9 + $0x28] sm:$0xff] %vm263_vm0, %v1828_v0  ;;  %v1456_v18 = vadd.f32 %v1455_v40, %v1342_v33  ;;  %1757 = vmatmul.f32.gmra.mxu1 %v1651_v51  ;;  %v1568_v10 = vpop.f32.mrf.mxu0  ;;  %v3424_v0 = vld [vmem:[#allocation12_spill] sm:$0xff] }
 0x2ee   : > { %v1194_v33 = vadd.f32 %v3139_v8, %v3424_v0  ;;  %v1802_v8 = vld [vmem:[%s2230_s24 + $0x58] sm:$0xff] }
 0x2ef   : > { %v1569_v14 = vadd.f32 %v1568_v10, %v1456_v18 }
 0x2f1   : > { %v1620_v32 = vadd.f32 %v1569_v14, %v1182_v39 }
 0x2f2   : > { %v1713_v24 = vpop.f32.mrf.mxu1 }
 0x2f3   : > { %v1652_v36 = vmax.f32 %v1620_v32, 0.0  ;;  %v1829_v42 = vadd.f32 %v1797_v47, %v1713_v24  ;;  %v1461_v53 = vpop.f32.mrf.mxu3 }
 0x2f4   : > { %v1345_v60 = vpop.f32.mrf.mxu2 }
 0x2f5   : > { %1861 = vst.msk [vmem:[%s3177_s9 + $0x30] sm:$0xff] %vm263_vm0, %v1829_v42  ;;  %v1459_v2 = vadd.f32 %v1458_v25, %v1345_v60  ;;  %1760 = vmatmul.f32.gmra.mxu1 %v1652_v36  ;;  %v1571_v41 = vpop.f32.mrf.mxu0  ;;  %v3425_v36 = vld [vmem:[#allocation11_spill] sm:$0xff] }
 0x2f6   : > { %v1197_v42 = vadd.f32 %v3146_v1, %v3425_v36  ;;  %v1803_v1 = vld [vmem:[%s2230_s24 + $0x60] sm:$0xff] }
 0x2f7   : > { %v1572_v38 = vadd.f32 %v1571_v41, %v1459_v2 }
 0x2f9   : > { %v1621_v30 = vadd.f32 %v1572_v38, %v1185_v50 }
 0x2fa   : > { %v1716_v46 = vpop.f32.mrf.mxu1 }
 0x2fb   : > { %v1653_v4 = vmax.f32 %v1621_v30, 0.0  ;;  %v1830_v28 = vadd.f32 %v1798_v12, %v1716_v46  ;;  %v1464_v56 = vpop.f32.mrf.mxu3  ;;  %v1200_v46 = vadd.f32 %v3151_v62, %v3060_v27 }
 0x2fc   : > { %v1348_v59 = vpop.f32.mrf.mxu2 }
 0x2fd   : > { %1862 = vst.msk [vmem:[%s3177_s9 + $0x38] sm:$0xff] %vm263_vm0, %v1830_v28  ;;  %v1462_v22 = vadd.f32 %v1461_v53, %v1348_v59  ;;  %1763 = vmatmul.f32.gmra.mxu1 %v1653_v4  ;;  %v1574_v23 = vpop.f32.mrf.mxu0 }
 0x2ff   : > { %v1575_v57 = vadd.f32 %v1574_v23, %v1462_v22 }
 0x301   : > { %v1622_v37 = vadd.f32 %v1575_v57, %v1188_v16  ;;  %v1203_v57 = vadd.f32 %v3156_v20, %v3067_v61  ;;  %v1805_v61 = vld [vmem:[%s2230_s24 + $0x70] sm:$0xff] }
 0x302   : > { %v1719_v26 = vpop.f32.mrf.mxu1 }
 0x303   : > { %v1654_v58 = vmax.f32 %v1622_v37, 0.0  ;;  %v1831_v13 = vadd.f32 %v1799_v5, %v1719_v26  ;;  %v1467_v63 = vpop.f32.mrf.mxu3  ;;  %v1804_v37 = vld [vmem:[%s2230_s24 + $0x68] sm:$0xff] }
 0x304   : > { %v1351_v9 = vpop.f32.mrf.mxu2 }
 0x305   : > { %1863 = vst.msk [vmem:[%s3177_s9 + $0x40] sm:$0xff] %vm263_vm0, %v1831_v13  ;;  %v1465_v54 = vadd.f32 %v1464_v56, %v1351_v9  ;;  %1766 = vmatmul.f32.gmra.mxu1 %v1654_v58  ;;  %v1577_v43 = vpop.f32.mrf.mxu0 }
 0x307   : > { %v1578_v35 = vadd.f32 %v1577_v43, %v1465_v54 }
 0x309   : > { %v1623_v40 = vadd.f32 %v1578_v35, %v1191_v48 }
 0x30a   : > { %v1722_v52 = vpop.f32.mrf.mxu1 }
 0x30b   : > { %v1655_v45 = vmax.f32 %v1623_v40, 0.0  ;;  %v1832_v21 = vadd.f32 %v1800_v17, %v1722_v52  ;;  %v1470_v51 = vpop.f32.mrf.mxu3 }
 0x30c   : > { %v1354_v44 = vpop.f32.mrf.mxu2 }
 0x30d   : > { %1864 = vst.msk [vmem:[%s3177_s9 + $0x48] sm:$0xff] %vm263_vm0, %v1832_v21  ;;  %v1468_v55 = vadd.f32 %v1467_v63, %v1354_v44  ;;  %1769 = vmatmul.f32.gmra.mxu1 %v1655_v45  ;;  %v1580_v3 = vpop.f32.mrf.mxu0  ;;  %v1206_v63 = vadd.f32 %v3163_v34, %v3075_v6  ;;  %v1209_v6 = vadd.f32 %v3167_v19, %v3083_v31  ;;  %v1806_v44 = vld [vmem:[%s2230_s24 + $0x78] sm:$0xff]  ;;  %v1808_v31 = vld [vmem:[%s2230_s24 + $0x88] sm:$0xff] }
 0x30f   : > { %v1581_v18 = vadd.f32 %v1580_v3, %v1468_v55 }
 0x311   : > { %v1624_v10 = vadd.f32 %v1581_v18, %v1194_v33  ;;  %v1807_v33 = vld [vmem:[%s2230_s24 + $0x80] sm:$0xff] }
 0x312   : > { %v1725_v25 = vpop.f32.mrf.mxu1 }
 0x313   : > { %v1656_v29 = vmax.f32 %v1624_v10, 0.0  ;;  %v1833_v39 = vadd.f32 %v1801_v7, %v1725_v25  ;;  %v1473_v24 = vpop.f32.mrf.mxu3  ;;  %v1809_v25 = vld [vmem:[%s2230_s24 + $0x90] sm:$0xff] }
 0x314   : > { %v1357_v14 = vpop.f32.mrf.mxu2 }
 0x315   : > { %1865 = vst.msk [vmem:[%s3177_s9 + $0x50] sm:$0xff] %vm263_vm0, %v1833_v39  ;;  %v1471_v47 = vadd.f32 %v1470_v51, %v1357_v14  ;;  %1772 = vmatmul.f32.gmra.mxu1 %v1656_v29  ;;  %v1583_v32 = vpop.f32.mrf.mxu0  ;;  %v1810_v14 = vld [vmem:[%s2230_s24 + $0x98] sm:$0xff] }
 0x317   : > { %v1584_v60 = vadd.f32 %v1583_v32, %v1471_v47 }
 0x319   : > { %v1625_v2 = vadd.f32 %v1584_v60, %v1197_v42  ;;  %v1812_v60 = vld [vmem:[%s2230_s24 + $0xa8] sm:$0xff] }
 0x31a   : > { %v1728_v41 = vpop.f32.mrf.mxu1 }
 0x31b   : > { %v1657_v53 = vmax.f32 %v1625_v2, 0.0  ;;  %v1834_v11 = vadd.f32 %v1802_v8, %v1728_v41  ;;  %v1476_v30 = vpop.f32.mrf.mxu3  ;;  %v1813_v41 = vld [vmem:[%s2230_s24 + $0xb0] sm:$0xff] }
 0x31c   : > { %v1360_v50 = vpop.f32.mrf.mxu2 }
 0x31d   : > { %1866 = vst.msk [vmem:[%s3177_s9 + $0x58] sm:$0xff] %vm263_vm0, %v1834_v11  ;;  %v1474_v38 = vadd.f32 %v1473_v24, %v1360_v50  ;;  %1775 = vmatmul.f32.gmra.mxu1 %v1657_v53  ;;  %v1586_v12 = vpop.f32.mrf.mxu0  ;;  %v1811_v24 = vld [vmem:[%s2230_s24 + $0xa0] sm:$0xff]  ;;  %v1814_v50 = vld [vmem:[%s2230_s24 + $0xb8] sm:$0xff] }
 0x31f   : > { %v1587_v4 = vadd.f32 %v1586_v12, %v1474_v38 }
 0x321   : > { %v1626_v28 = vadd.f32 %v1587_v4, %v1200_v46 }
 0x322   : > { %v1731_v59 = vpop.f32.mrf.mxu1 }
 0x323   : > { %v1658_v22 = vmax.f32 %v1626_v28, 0.0  ;;  %v1835_v23 = vadd.f32 %v1803_v1, %v1731_v59  ;;  %v1479_v27 = vpop.f32.mrf.mxu3  ;;  %v1816_v1 = vld [vmem:[%s2230_s24 + $0xc8] sm:$0xff] }
 0x324   : > { %v1363_v56 = vpop.f32.mrf.mxu2 }
 0x325   : > { %1867 = vst.msk [vmem:[%s3177_s9 + $0x60] sm:$0xff] %vm263_vm0, %v1835_v23  ;;  %v1477_v49 = vadd.f32 %v1476_v30, %v1363_v56  ;;  %1778 = vmatmul.f32.gmra.mxu1 %v1658_v22  ;;  %v1589_v16 = vpop.f32.mrf.mxu0  ;;  %v1815_v30 = vld [vmem:[%s2230_s24 + $0xc0] sm:$0xff]  ;;  %v1817_v22 = vld [vmem:[%s2230_s24 + $0xd0] sm:$0xff] }
 0x327   : > { %v1590_v5 = vadd.f32 %v1589_v16, %v1477_v49  ;;  %v1818_v49 = vld [vmem:[%s2230_s24 + $0xd8] sm:$0xff] }
 0x329   : > { %v1627_v62 = vadd.f32 %v1590_v5, %v1203_v57  ;;  %v1819_v5 = vld [vmem:[%s2230_s24 + $0xe0] sm:$0xff] }
 0x32a   : > { %v1734_v26 = vpop.f32.mrf.mxu1 }
 0x32b   : > { %v1659_v58 = vmax.f32 %v1627_v62, 0.0  ;;  %v1836_v13 = vadd.f32 %v1804_v37, %v1734_v26  ;;  %v1482_v35 = vpop.f32.mrf.mxu3  ;;  %v1820_v62 = vld [vmem:[%s2230_s24 + $0xe8] sm:$0xff] }
 0x32c   : > { %v1366_v9 = vpop.f32.mrf.mxu2 }
 0x32d   : > { %1868 = vst.msk [vmem:[%s3177_s9 + $0x68] sm:$0xff] %vm263_vm0, %v1836_v13  ;;  %v1480_v54 = vadd.f32 %v1479_v27, %v1366_v9  ;;  %1781 = vmatmul.f32.gmra.mxu1 %v1659_v58  ;;  %v1592_v43 = vpop.f32.mrf.mxu0  ;;  %v1821_v13 = vld [vmem:[%s2230_s24 + $0xf0] sm:$0xff] }
 0x32f   : > { %v1593_v15 = vadd.f32 %v1592_v43, %v1480_v54  ;;  %v1822_v43 = vld [vmem:[%s2230_s24 + $0xf8] sm:$0xff] }
 0x331   : > { %v1628_v20 = vadd.f32 %v1593_v15, %v1206_v63 }
 0x332   : > { %v1737_v48 = vpop.f32.mrf.mxu1 }
 0x333   : > { %v1660_v17 = vmax.f32 %v1628_v20, 0.0  ;;  %v1837_v40 = vadd.f32 %v1805_v61, %v1737_v48 }
 0x334   : > { %v1369_v52 = vpop.f32.mrf.mxu2 }
 0x335   : > { %1869 = vst.msk [vmem:[%s3177_s9 + $0x70] sm:$0xff] %vm263_vm0, %v1837_v40  ;;  %v1483_v45 = vadd.f32 %v1482_v35, %v1369_v52  ;;  %1784 = vmatmul.f32.gmra.mxu1 %v1660_v17  ;;  %v1595_v21 = vpop.f32.mrf.mxu0 }
 0x337   : > { %v1596_v34 = vadd.f32 %v1595_v21, %v1483_v45 }
 0x339   : > { %v1629_v55 = vadd.f32 %v1596_v34, %v1209_v6 }
 0x33a   : > { %v1740_v3 = vpop.f32.mrf.mxu1 }
 0x33b   : > { %v1661_v51 = vmax.f32 %v1629_v55, 0.0  ;;  %v1838_v0 = vadd.f32 %v1806_v44, %v1740_v3 }
 0x33d   : > { %1870 = vst.msk [vmem:[%s3177_s9 + $0x78] sm:$0xff] %vm263_vm0, %v1838_v0  ;;  %1787 = vmatmul.f32.gmra.mxu1 %v1661_v51 }
 0x342   : > { %v1743_v18 = vpop.f32.mrf.mxu1 }
 0x343   : > { %v1839_v7 = vadd.f32 %v1807_v33, %v1743_v18 }
 0x345   : > { %1871 = vst.msk [vmem:[%s3177_s9 + $0x80] sm:$0xff] %vm263_vm0, %v1839_v7 }
 0x34a   : > { %v1746_v19 = vpop.f32.mrf.mxu1 }
 0x34b   : > { %v1840_v10 = vadd.f32 %v1808_v31, %v1746_v19 }
 0x34d   : > { %1872 = vst.msk [vmem:[%s3177_s9 + $0x88] sm:$0xff] %vm263_vm0, %v1840_v10 }
 0x352   : > { %v1749_v29 = vpop.f32.mrf.mxu1 }
 0x353   : > { %v1841_v39 = vadd.f32 %v1809_v25, %v1749_v29 }
 0x355   : > { %1873 = vst.msk [vmem:[%s3177_s9 + $0x90] sm:$0xff] %vm263_vm0, %v1841_v39 }
 0x35a   : > { %v1752_v47 = vpop.f32.mrf.mxu1 }
 0x35b   : > { %v1842_v32 = vadd.f32 %v1810_v14, %v1752_v47 }
 0x35d   : > { %1874 = vst.msk [vmem:[%s3177_s9 + $0x98] sm:$0xff] %vm263_vm0, %v1842_v32 }
 0x362   : > { %v1755_v36 = vpop.f32.mrf.mxu1 }
 0x363   : > { %v1843_v42 = vadd.f32 %v1811_v24, %v1755_v36 }
 0x365   : > { %1875 = vst.msk [vmem:[%s3177_s9 + $0xa0] sm:$0xff] %vm263_vm0, %v1843_v42 }
 0x36a   : > { %v1758_v8 = vpop.f32.mrf.mxu1 }
 0x36b   : > { %v1844_v2 = vadd.f32 %v1812_v60, %v1758_v8 }
 0x36d   : > { %1876 = vst.msk [vmem:[%s3177_s9 + $0xa8] sm:$0xff] %vm263_vm0, %v1844_v2 }
 0x372   : > { %v1761_v53 = vpop.f32.mrf.mxu1 }
 0x373   : > { %v1845_v11 = vadd.f32 %v1813_v41, %v1761_v53 }
 0x375   : > { %1877 = vst.msk [vmem:[%s3177_s9 + $0xb0] sm:$0xff] %vm263_vm0, %v1845_v11 }
 0x37a   : > { %v1764_v38 = vpop.f32.mrf.mxu1 }
 0x37b   : > { %v1846_v12 = vadd.f32 %v1814_v50, %v1764_v38 }
 0x37d   : > { %1878 = vst.msk [vmem:[%s3177_s9 + $0xb8] sm:$0xff] %vm263_vm0, %v1846_v12 }
 0x382   : > { %v1767_v46 = vpop.f32.mrf.mxu1 }
 0x383   : > { %v1847_v4 = vadd.f32 %v1815_v30, %v1767_v46 }
 0x385   : > { %1879 = vst.msk [vmem:[%s3177_s9 + $0xc0] sm:$0xff] %vm263_vm0, %v1847_v4 }
 0x38a   : > { %v1770_v28 = vpop.f32.mrf.mxu1 }
 0x38b   : > { %v1848_v59 = vadd.f32 %v1816_v1, %v1770_v28 }
 0x38d   : > { %1880 = vst.msk [vmem:[%s3177_s9 + $0xc8] sm:$0xff] %vm263_vm0, %v1848_v59 }
 0x392   : > { %v1773_v23 = vpop.f32.mrf.mxu1 }
 0x393   : > { %v1849_v56 = vadd.f32 %v1817_v22, %v1773_v23 }
 0x395   : > { %1881 = vst.msk [vmem:[%s3177_s9 + $0xd0] sm:$0xff] %vm263_vm0, %v1849_v56 }
 0x39a   : > { %v1776_v16 = vpop.f32.mrf.mxu1 }
 0x39b   : > { %v1850_v57 = vadd.f32 %v1818_v49, %v1776_v16 }
 0x39d   : > { %1882 = vst.msk [vmem:[%s3177_s9 + $0xd8] sm:$0xff] %vm263_vm0, %v1850_v57 }
 0x3a2   : > { %v1779_v37 = vpop.f32.mrf.mxu1 }
 0x3a3   : > { %v1851_v27 = vadd.f32 %v1819_v5, %v1779_v37 }
 0x3a5   : > { %1883 = vst.msk [vmem:[%s3177_s9 + $0xe0] sm:$0xff] %vm263_vm0, %v1851_v27 }
 0x3aa   : > { %v1782_v26 = vpop.f32.mrf.mxu1 }
 0x3ab   : > { %v1852_v58 = vadd.f32 %v1820_v62, %v1782_v26 }
 0x3ad   : > { %1884 = vst.msk [vmem:[%s3177_s9 + $0xe8] sm:$0xff] %vm263_vm0, %v1852_v58 }
 0x3b2   : > { %v1785_v9 = vpop.f32.mrf.mxu1 }
 0x3b3   : > { %v1853_v54 = vadd.f32 %v1821_v13, %v1785_v9 }
 0x3b5   : > { %1885 = vst.msk [vmem:[%s3177_s9 + $0xf0] sm:$0xff] %vm263_vm0, %v1853_v54 }
 0x3ba   : > { %v1788_v63 = vpop.f32.mrf.mxu1 }
 0x3bb   : > { %v1854_v15 = vadd.f32 %v1822_v43, %v1788_v63 }
 0x3bd   : > { %1886 = vst.msk [vmem:[%s3177_s9 + $0xf8] sm:$0xff] %vm263_vm0, %v1854_v15 }
 0x3be PF: > { %s14_s12 = sadd.s32 1, %s2172_s12  }
 0x3bf   : > { %p11_p7 = scmp.ge.s32.totalorder %s14_s12, 4  }
 0x3c1   :  { %13 = sbr.rel (!%p11_p7) target bundleno = 1 (0x1), region = 69 }
 0x3c6   :  { %1908 = vsyncpa [#allocation4], 1 }
 0x3c7   :  { %1910 = vsyncpa [#allocation4 + $0x1], 1 }

</bundles_post_ra>
